<compile_context>
chip_gen: v7x
topology: tpu7x:2x2x1
jax: 0.10.0
libtpu: 0.0.40
codegen_flags: <defaults>
</compile_context>

<pallas_src>
import jax
import jax.numpy as jnp
from jax.experimental import pallas as pl
from jax.experimental.pallas import tpu as pltpu

LANE = 128  # lane width; logits output is padded to this for dense stores


# ----------------------------------------------------------------------------
# Kernel: one padded NHWC image -> conv3x3 + bias + ReLU -> GAP -> linear head
# ----------------------------------------------------------------------------
def _conv_gap_head_kernel(xp_ref, cw_ref, cb_ref, hw_ref, hb_ref, o_ref):
    # xp_ref: (1, H+2, W+2, Cin)  bf16   padded input image for this grid step
    # cw_ref: (K*K, Cin, Cout)    bf16   per-tap conv weight slices
    # cb_ref: (1, Cout)           f32    conv bias
    # hw_ref: (Cout, LANE)        f32    head weight, lane-padded (cols >= nc are 0)
    # hb_ref: (1, LANE)           f32    head bias, lane-padded
    # o_ref : (1, 1, LANE)        f32    lane-padded logits row for this image
    Hp, Wp, Cin = xp_ref.shape[1], xp_ref.shape[2], xp_ref.shape[3]
    H, W = Hp - 2, Wp - 2
    Cout = cw_ref.shape[2]
    n_taps = cw_ref.shape[0]

    x = xp_ref[0]                                         # (H+2, W+2, Cin) bf16

    # Conv as 9 shifted accumulating dots ("in-kernel im2col", never hits HBM).
    acc = jnp.zeros((H * W, Cout), jnp.float32)
    for tap in range(n_taps):                             # static unroll (9 taps)
        dy, dx = tap // 3, tap % 3
        shifted = x[dy:dy + H, dx:dx + W, :].reshape(H * W, Cin)
        acc = acc + jnp.dot(shifted, cw_ref[tap],
                            preferred_element_type=jnp.float32)

    feat = jnp.maximum(acc + cb_ref[...], 0.0)            # (H*W, Cout) f32

    # Global average pool (fused; feature map never leaves VMEM).
    gap = jnp.sum(feat, axis=0, keepdims=True) * (1.0 / (H * W))  # (1, Cout)

    # Linear head, computed against lane-padded weights -> dense 128-wide store.
    logits = jnp.dot(gap, hw_ref[...],
                     preferred_element_type=jnp.float32) + hb_ref[...]
    o_ref[0] = logits                                     # (1, LANE)


# ----------------------------------------------------------------------------
# Wrapper
# ----------------------------------------------------------------------------
def net_forward(x_nchw, params):
    """x_nchw: (B, 3, H, W) float32.  Returns logits (B, 2) float32."""
    conv_w, conv_b = params["conv_w"], params["conv_b"]
    head_w, head_b = params["head_w"], params["head_b"]
    B, Cin, H, W = x_nchw.shape
    K = conv_w.shape[0]
    Cout = conv_w.shape[-1]
    num_classes = head_w.shape[1]
    Hp, Wp = H + 2, W + 2

    # Glue: NCHW -> NHWC, spatial pad (3x3, stride 1, pad 1), bf16 at the boundary.
    x = jnp.transpose(x_nchw, (0, 2, 3, 1))
    x_pad = jnp.pad(x, ((0, 0), (1, 1), (1, 1), (0, 0))).astype(jnp.bfloat16)

    # NOTE: real PyTorch conv weights come as (Cout, Cin, K, K); they must be
    # permuted to (K, K, Cin, Cout) before being handed to this wrapper.
    cw = conv_w.reshape(K * K, Cin, Cout).astype(jnp.bfloat16)   # per-tap slices
    cb = conv_b.reshape(1, Cout).astype(jnp.float32)
    hw = jnp.zeros((Cout, LANE), jnp.float32).at[:, :num_classes].set(head_w)
    hb = jnp.zeros((1, LANE), jnp.float32).at[:, :num_classes].set(
        head_b.reshape(1, num_classes))

    out = pl.pallas_call(
        _conv_gap_head_kernel,
        out_shape=jax.ShapeDtypeStruct((B, 1, LANE), jnp.float32),
        grid_spec=pltpu.PrefetchScalarGridSpec(
            num_scalar_prefetch=0,
            grid=(B,),  # one image per grid step; input DMA pipelined across steps
            in_specs=[
                pl.BlockSpec((1, Hp, Wp, Cin), lambda b: (b, 0, 0, 0)),
                pl.BlockSpec((K * K, Cin, Cout), lambda b: (0, 0, 0)),
                pl.BlockSpec((1, Cout), lambda b: (0, 0)),
                pl.BlockSpec((Cout, LANE), lambda b: (0, 0)),
                pl.BlockSpec((1, LANE), lambda b: (0, 0)),
            ],
            out_specs=pl.BlockSpec((1, 1, LANE), lambda b: (b, 0, 0)),
        ),
        compiler_params=pltpu.CompilerParams(
            dimension_semantics=("parallel",),        # shards over 2 TCs on v7x
            vmem_limit_bytes=32 * 1024 * 1024,        # safe on v5e/v6e/v7x
        ),
    )(x_pad, cw, cb, hw, hb)

    return out[:, 0, :num_classes]


# ----------------------------------------------------------------------------
# Params + pure-JAX reference
# ----------------------------------------------------------------------------
def init_params(key, cin=3, cout=16, k=3, num_classes=2):
    k1, k2, k3, k4 = jax.random.split(key, 4)
    fan_in = k * k * cin
    conv_w = jax.random.normal(k1, (k, k, cin, cout), jnp.float32) / jnp.sqrt(fan_in)
    conv_b = 0.01 * jax.random.normal(k2, (cout,), jnp.float32)
    head_w = jax.random.normal(k3, (cout, num_classes), jnp.float32) / jnp.sqrt(cout)
    head_b = 0.01 * jax.random.normal(k4, (num_classes,), jnp.float32)
    return {"conv_w": conv_w, "conv_b": conv_b, "head_w": head_w, "head_b": head_b}


def _reference_forward(x_nchw, params):
    conv_w, conv_b = params["conv_w"], params["conv_b"]
    head_w, head_b = params["head_w"], params["head_b"]
    B, Cin, H, W = x_nchw.shape
    K = conv_w.shape[0]
    x = jnp.transpose(x_nchw, (0, 2, 3, 1))
    xp = jnp.pad(x, ((0, 0), (1, 1), (1, 1), (0, 0)))
    acc = jnp.zeros((B, H, W, conv_w.shape[-1]), jnp.float32)
    for dy in range(K):
        for dx in range(K):
            acc = acc + jnp.einsum("bhwc,co->bhwo",
                                   xp[:, dy:dy + H, dx:dx + W, :], conv_w[dy, dx])
    feat = jnp.maximum(acc + conv_b, 0.0)
    gap = feat.mean(axis=(1, 2))
    return gap @ head_w + head_b


if __name__ == "__main__":
    key = jax.random.PRNGKey(0)
    kx, kp = jax.random.split(key)
    # PyTorch-style NCHW input: batch=2, in_chans=3, 16x16 spatial.
    x = jax.random.normal(kx, (2, 3, 16, 16), jnp.float32)
    params = init_params(kp)

    logits = net_forward(x, params)
    jax.block_until_ready(logits)
    assert logits.shape == (2, 2) and logits.dtype == jnp.float32

    ref = _reference_forward(x, params)
    assert jnp.allclose(logits, ref, atol=5e-2, rtol=5e-2), (logits, ref)
    print("KERNEL_OK")
</pallas_src>

<mosaic_0001>
module attributes {stable_mosaic.version = 11 : i64} {
  func.func @_conv_gap_head_kernel(%arg0: i32, %arg1: memref<1x18x18x3xbf16, #tpu.memory_space<vmem>>, %arg2: memref<9x3x16xbf16, #tpu.memory_space<vmem>>, %arg3: memref<1x16xf32, #tpu.memory_space<vmem>>, %arg4: memref<16x128xf32, #tpu.memory_space<vmem>>, %arg5: memref<1x128xf32, #tpu.memory_space<vmem>>, %arg6: memref<1x1x128xf32, #tpu.memory_space<vmem>>) attributes {dimension_semantics = [#tpu.dimension_semantics<parallel>], iteration_bounds = array<i64: 2>, scalar_prefetch = 0 : i64, scratch_operands = 0 : i64, tpu.core_type = #tpu.core_type<tc>, window_params = [{transform_indices = @transform_0, window_bounds = array<i64: 1, 18, 18, 3>}, {pipeline_mode = #tpu.pipeline_mode<synchronous>, transform_indices = @transform_1, window_bounds = array<i64: 9, 3, 16>}, {pipeline_mode = #tpu.pipeline_mode<synchronous>, transform_indices = @transform_2, window_bounds = array<i64: 1, 16>}, {pipeline_mode = #tpu.pipeline_mode<synchronous>, transform_indices = @transform_3, window_bounds = array<i64: 16, 128>}, {pipeline_mode = #tpu.pipeline_mode<synchronous>, transform_indices = @transform_4, window_bounds = array<i64: 1, 128>}, {transform_indices = @transform_5, window_bounds = array<i64: 1, 1, 128>}]} {
    %c0 = arith.constant 0 : index
    %c0_0 = arith.constant 0 : index
    %c0_1 = arith.constant 0 : index
    %c0_2 = arith.constant 0 : index
    %0 = vector.load %arg1[%c0, %c0_0, %c0_1, %c0_2] : memref<1x18x18x3xbf16, #tpu.memory_space<vmem>>, vector<1x18x18x3xbf16>
    %1 = vector.shape_cast %0 : vector<1x18x18x3xbf16> to vector<18x18x3xbf16>
    %cst = arith.constant 0.000000e+00 : f32
    %2 = vector.broadcast %cst : f32 to vector<256x16xf32>
    %3 = vector.extract_strided_slice %1 {offsets = [0, 0, 0], sizes = [16, 16, 3], strides = [1, 1, 1]} : vector<18x18x3xbf16> to vector<16x16x3xbf16>
    %4 = vector.shape_cast %3 : vector<16x16x3xbf16> to vector<256x3xbf16>
    %c0_3 = arith.constant 0 : index
    %c0_4 = arith.constant 0 : index
    %c0_5 = arith.constant 0 : index
    %5 = vector.load %arg2[%c0_3, %c0_4, %c0_5] : memref<9x3x16xbf16, #tpu.memory_space<vmem>>, vector<1x3x16xbf16>
    %6 = vector.shape_cast %5 : vector<1x3x16xbf16> to vector<3x16xbf16>
    %cst_6 = arith.constant dense<0.000000e+00> : vector<256x16xf32>
    %7 = tpu.matmul %4, %6, %cst_6 {dimension_numbers = #tpu.dot_dimension_numbers<[1], [0], [0], [1], [0, 0, 1, 1], [], []>} : vector<256x3xbf16>, vector<3x16xbf16>, vector<256x16xf32> -> vector<256x16xf32>
    %8 = arith.addf %2, %7 : vector<256x16xf32>
    %9 = vector.extract_strided_slice %1 {offsets = [0, 1, 0], sizes = [16, 16, 3], strides = [1, 1, 1]} : vector<18x18x3xbf16> to vector<16x16x3xbf16>
    %10 = vector.shape_cast %9 : vector<16x16x3xbf16> to vector<256x3xbf16>
    %c1 = arith.constant 1 : index
    %c0_7 = arith.constant 0 : index
    %c0_8 = arith.constant 0 : index
    %11 = vector.load %arg2[%c1, %c0_7, %c0_8] : memref<9x3x16xbf16, #tpu.memory_space<vmem>>, vector<1x3x16xbf16>
    %12 = vector.shape_cast %11 : vector<1x3x16xbf16> to vector<3x16xbf16>
    %cst_9 = arith.constant dense<0.000000e+00> : vector<256x16xf32>
    %13 = tpu.matmul %10, %12, %cst_9 {dimension_numbers = #tpu.dot_dimension_numbers<[1], [0], [0], [1], [0, 0, 1, 1], [], []>} : vector<256x3xbf16>, vector<3x16xbf16>, vector<256x16xf32> -> vector<256x16xf32>
    %14 = arith.addf %8, %13 : vector<256x16xf32>
    %15 = vector.extract_strided_slice %1 {offsets = [0, 2, 0], sizes = [16, 16, 3], strides = [1, 1, 1]} : vector<18x18x3xbf16> to vector<16x16x3xbf16>
    %16 = vector.shape_cast %15 : vector<16x16x3xbf16> to vector<256x3xbf16>
    %c2 = arith.constant 2 : index
    %c0_10 = arith.constant 0 : index
    %c0_11 = arith.constant 0 : index
    %17 = vector.load %arg2[%c2, %c0_10, %c0_11] : memref<9x3x16xbf16, #tpu.memory_space<vmem>>, vector<1x3x16xbf16>
    %18 = vector.shape_cast %17 : vector<1x3x16xbf16> to vector<3x16xbf16>
    %cst_12 = arith.constant dense<0.000000e+00> : vector<256x16xf32>
    %19 = tpu.matmul %16, %18, %cst_12 {dimension_numbers = #tpu.dot_dimension_numbers<[1], [0], [0], [1], [0, 0, 1, 1], [], []>} : vector<256x3xbf16>, vector<3x16xbf16>, vector<256x16xf32> -> vector<256x16xf32>
    %20 = arith.addf %14, %19 : vector<256x16xf32>
    %21 = vector.extract_strided_slice %1 {offsets = [1, 0, 0], sizes = [16, 16, 3], strides = [1, 1, 1]} : vector<18x18x3xbf16> to vector<16x16x3xbf16>
    %22 = vector.shape_cast %21 : vector<16x16x3xbf16> to vector<256x3xbf16>
    %c3 = arith.constant 3 : index
    %c0_13 = arith.constant 0 : index
    %c0_14 = arith.constant 0 : index
    %23 = vector.load %arg2[%c3, %c0_13, %c0_14] : memref<9x3x16xbf16, #tpu.memory_space<vmem>>, vector<1x3x16xbf16>
    %24 = vector.shape_cast %23 : vector<1x3x16xbf16> to vector<3x16xbf16>
    %cst_15 = arith.constant dense<0.000000e+00> : vector<256x16xf32>
    %25 = tpu.matmul %22, %24, %cst_15 {dimension_numbers = #tpu.dot_dimension_numbers<[1], [0], [0], [1], [0, 0, 1, 1], [], []>} : vector<256x3xbf16>, vector<3x16xbf16>, vector<256x16xf32> -> vector<256x16xf32>
    %26 = arith.addf %20, %25 : vector<256x16xf32>
    %27 = vector.extract_strided_slice %1 {offsets = [1, 1, 0], sizes = [16, 16, 3], strides = [1, 1, 1]} : vector<18x18x3xbf16> to vector<16x16x3xbf16>
    %28 = vector.shape_cast %27 : vector<16x16x3xbf16> to vector<256x3xbf16>
    %c4 = arith.constant 4 : index
    %c0_16 = arith.constant 0 : index
    %c0_17 = arith.constant 0 : index
    %29 = vector.load %arg2[%c4, %c0_16, %c0_17] : memref<9x3x16xbf16, #tpu.memory_space<vmem>>, vector<1x3x16xbf16>
    %30 = vector.shape_cast %29 : vector<1x3x16xbf16> to vector<3x16xbf16>
    %cst_18 = arith.constant dense<0.000000e+00> : vector<256x16xf32>
    %31 = tpu.matmul %28, %30, %cst_18 {dimension_numbers = #tpu.dot_dimension_numbers<[1], [0], [0], [1], [0, 0, 1, 1], [], []>} : vector<256x3xbf16>, vector<3x16xbf16>, vector<256x16xf32> -> vector<256x16xf32>
    %32 = arith.addf %26, %31 : vector<256x16xf32>
    %33 = vector.extract_strided_slice %1 {offsets = [1, 2, 0], sizes = [16, 16, 3], strides = [1, 1, 1]} : vector<18x18x3xbf16> to vector<16x16x3xbf16>
    %34 = vector.shape_cast %33 : vector<16x16x3xbf16> to vector<256x3xbf16>
    %c5 = arith.constant 5 : index
    %c0_19 = arith.constant 0 : index
    %c0_20 = arith.constant 0 : index
    %35 = vector.load %arg2[%c5, %c0_19, %c0_20] : memref<9x3x16xbf16, #tpu.memory_space<vmem>>, vector<1x3x16xbf16>
    %36 = vector.shape_cast %35 : vector<1x3x16xbf16> to vector<3x16xbf16>
    %cst_21 = arith.constant dense<0.000000e+00> : vector<256x16xf32>
    %37 = tpu.matmul %34, %36, %cst_21 {dimension_numbers = #tpu.dot_dimension_numbers<[1], [0], [0], [1], [0, 0, 1, 1], [], []>} : vector<256x3xbf16>, vector<3x16xbf16>, vector<256x16xf32> -> vector<256x16xf32>
    %38 = arith.addf %32, %37 : vector<256x16xf32>
    %39 = vector.extract_strided_slice %1 {offsets = [2, 0, 0], sizes = [16, 16, 3], strides = [1, 1, 1]} : vector<18x18x3xbf16> to vector<16x16x3xbf16>
    %40 = vector.shape_cast %39 : vector<16x16x3xbf16> to vector<256x3xbf16>
    %c6 = arith.constant 6 : index
    %c0_22 = arith.constant 0 : index
    %c0_23 = arith.constant 0 : index
    %41 = vector.load %arg2[%c6, %c0_22, %c0_23] : memref<9x3x16xbf16, #tpu.memory_space<vmem>>, vector<1x3x16xbf16>
    %42 = vector.shape_cast %41 : vector<1x3x16xbf16> to vector<3x16xbf16>
    %cst_24 = arith.constant dense<0.000000e+00> : vector<256x16xf32>
    %43 = tpu.matmul %40, %42, %cst_24 {dimension_numbers = #tpu.dot_dimension_numbers<[1], [0], [0], [1], [0, 0, 1, 1], [], []>} : vector<256x3xbf16>, vector<3x16xbf16>, vector<256x16xf32> -> vector<256x16xf32>
    %44 = arith.addf %38, %43 : vector<256x16xf32>
    %45 = vector.extract_strided_slice %1 {offsets = [2, 1, 0], sizes = [16, 16, 3], strides = [1, 1, 1]} : vector<18x18x3xbf16> to vector<16x16x3xbf16>
    %46 = vector.shape_cast %45 : vector<16x16x3xbf16> to vector<256x3xbf16>
    %c7 = arith.constant 7 : index
    %c0_25 = arith.constant 0 : index
    %c0_26 = arith.constant 0 : index
    %47 = vector.load %arg2[%c7, %c0_25, %c0_26] : memref<9x3x16xbf16, #tpu.memory_space<vmem>>, vector<1x3x16xbf16>
    %48 = vector.shape_cast %47 : vector<1x3x16xbf16> to vector<3x16xbf16>
    %cst_27 = arith.constant dense<0.000000e+00> : vector<256x16xf32>
    %49 = tpu.matmul %46, %48, %cst_27 {dimension_numbers = #tpu.dot_dimension_numbers<[1], [0], [0], [1], [0, 0, 1, 1], [], []>} : vector<256x3xbf16>, vector<3x16xbf16>, vector<256x16xf32> -> vector<256x16xf32>
    %50 = arith.addf %44, %49 : vector<256x16xf32>
    %51 = vector.extract_strided_slice %1 {offsets = [2, 2, 0], sizes = [16, 16, 3], strides = [1, 1, 1]} : vector<18x18x3xbf16> to vector<16x16x3xbf16>
    %52 = vector.shape_cast %51 : vector<16x16x3xbf16> to vector<256x3xbf16>
    %c8 = arith.constant 8 : index
    %c0_28 = arith.constant 0 : index
    %c0_29 = arith.constant 0 : index
    %53 = vector.load %arg2[%c8, %c0_28, %c0_29] : memref<9x3x16xbf16, #tpu.memory_space<vmem>>, vector<1x3x16xbf16>
    %54 = vector.shape_cast %53 : vector<1x3x16xbf16> to vector<3x16xbf16>
    %cst_30 = arith.constant dense<0.000000e+00> : vector<256x16xf32>
    %55 = tpu.matmul %52, %54, %cst_30 {dimension_numbers = #tpu.dot_dimension_numbers<[1], [0], [0], [1], [0, 0, 1, 1], [], []>} : vector<256x3xbf16>, vector<3x16xbf16>, vector<256x16xf32> -> vector<256x16xf32>
    %56 = arith.addf %50, %55 : vector<256x16xf32>
    %c0_31 = arith.constant 0 : index
    %c0_32 = arith.constant 0 : index
    %57 = vector.load %arg3[%c0_31, %c0_32] : memref<1x16xf32, #tpu.memory_space<vmem>>, vector<1x16xf32>
    %58 = vector.broadcast %57 : vector<1x16xf32> to vector<256x16xf32>
    %59 = arith.addf %56, %58 : vector<256x16xf32>
    %cst_33 = arith.constant 0.000000e+00 : f32
    %60 = vector.broadcast %cst_33 : f32 to vector<256x16xf32>
    %61 = arith.maximumf %59, %60 : vector<256x16xf32>
    %cst_34 = arith.constant dense<0.000000e+00> : vector<16xf32>
    %62 = vector.multi_reduction <add>, %61, %cst_34 [0] : vector<256x16xf32> to vector<16xf32>
    %63 = vector.shape_cast %62 : vector<16xf32> to vector<1x16xf32>
    %cst_35 = arith.constant 3.906250e-03 : f32
    %64 = vector.broadcast %cst_35 : f32 to vector<1x16xf32>
    %65 = arith.mulf %63, %64 : vector<1x16xf32>
    %c0_36 = arith.constant 0 : index
    %c0_37 = arith.constant 0 : index
    %66 = vector.load %arg4[%c0_36, %c0_37] : memref<16x128xf32, #tpu.memory_space<vmem>>, vector<16x128xf32>
    %cst_38 = arith.constant dense<0.000000e+00> : vector<1x128xf32>
    %67 = tpu.matmul %65, %66, %cst_38 {dimension_numbers = #tpu.dot_dimension_numbers<[1], [0], [0], [1], [0, 0, 1, 1], [], []>} : vector<1x16xf32>, vector<16x128xf32>, vector<1x128xf32> -> vector<1x128xf32>
    %c0_39 = arith.constant 0 : index
    %c0_40 = arith.constant 0 : index
    %68 = vector.load %arg5[%c0_39, %c0_40] : memref<1x128xf32, #tpu.memory_space<vmem>>, vector<1x128xf32>
    %69 = arith.addf %67, %68 : vector<1x128xf32>
    %c0_41 = arith.constant 0 : index
    %c0_42 = arith.constant 0 : index
    %c0_43 = arith.constant 0 : index
    %70 = vector.load %arg6[%c0_41, %c0_42, %c0_43] : memref<1x1x128xf32, #tpu.memory_space<vmem>>, vector<1x1x128xf32>
    %71 = vector.shape_cast %70 : vector<1x1x128xf32> to vector<1x128xf32>
    %72 = vector.shape_cast %69 : vector<1x128xf32> to vector<1x1x128xf32>
    tpu.vector_store %arg6[%c0_41, %c0_42, %c0_43], %72 {strides = array<i32>} : memref<1x1x128xf32, #tpu.memory_space<vmem>>, vector<1x1x128xf32>,
    return
  }
  func.func @transform_0(%arg0: i32) -> (i32, i32, i32, i32) {
    %c0_i32 = arith.constant 0 : i32
    %c0_i32_0 = arith.constant 0 : i32
    %c0_i32_1 = arith.constant 0 : i32
    %c0_i32_2 = arith.constant 0 : i32
    return %arg0, %c0_i32, %c0_i32_0, %c0_i32_1 : i32, i32, i32, i32
  }
  func.func @transform_1(%arg0: i32) -> (i32, i32, i32) {
    %c0_i32 = arith.constant 0 : i32
    %c0_i32_0 = arith.constant 0 : i32
    %c0_i32_1 = arith.constant 0 : i32
    %c0_i32_2 = arith.constant 0 : i32
    return %c0_i32, %c0_i32_0, %c0_i32_1 : i32, i32, i32
  }
  func.func @transform_2(%arg0: i32) -> (i32, i32) {
    %c0_i32 = arith.constant 0 : i32
    %c0_i32_0 = arith.constant 0 : i32
    %c0_i32_1 = arith.constant 0 : i32
    return %c0_i32, %c0_i32_0 : i32, i32
  }
  func.func @transform_3(%arg0: i32) -> (i32, i32) {
    %c0_i32 = arith.constant 0 : i32
    %c0_i32_0 = arith.constant 0 : i32
    %c0_i32_1 = arith.constant 0 : i32
    return %c0_i32, %c0_i32_0 : i32, i32
  }
  func.func @transform_4(%arg0: i32) -> (i32, i32) {
    %c0_i32 = arith.constant 0 : i32
    %c0_i32_0 = arith.constant 0 : i32
    %c0_i32_1 = arith.constant 0 : i32
    return %c0_i32, %c0_i32_0 : i32, i32
  }
  func.func @transform_5(%arg0: i32) -> (i32, i32, i32) {
    %c0_i32 = arith.constant 0 : i32
    %c0_i32_0 = arith.constant 0 : i32
    %c0_i32_1 = arith.constant 0 : i32
    return %arg0, %c0_i32, %c0_i32_0 : i32, i32, i32
  }
}

</mosaic_0001>

<bundles_post_ra>
// kernel: tpu_custom_call.1
= control target key start
LH: loop header
LB: loop body
LE: loop exit
PB: predicated region body
PF: predicated region fallthrough
CT: control target
= control target key end

     0   :  { %10 = vsyncpa [#allocation3], 0  ;;  %s5501_s0 = inlined_call_operand.vmem [shape: bf16[2,18,18,3], index: 0, kind: input, shape index: {}]   ;;  %s5502_s1 = inlined_call_operand.vmem [shape: bf16[9,3,16], index: 1, kind: input, shape index: {}]   ;;  %s5503_s2 = inlined_call_operand.vmem [shape: f32[1,16], index: 2, kind: input, shape index: {}]   ;;  %s5504_s3 = inlined_call_operand.vmem [shape: f32[16,128], index: 3, kind: input, shape index: {}]   ;;  %s5505_s4 = inlined_call_operand.vmem [shape: f32[1,128], index: 4, kind: input, shape index: {}]   ;;  %s5506_s5 = inlined_call_operand.hbm [shape: f32[2,1,128], index: 5, kind: output, shape index: {}]  }
   0x1   :  { %12 = vsyncpa [#allocation3 + $0x1], 0  ;;  %s4356_s18 = smov 0   ;;  %s4358_s19 = smov 0  }
   0x2   :  { %s4360_s20 = smov 0   ;;  %s4362_s21 = smov 0  }
   0x3 LB: > { %s4377_s22 = sadd.s32 4294967295, %s4319_s21   ;;  %s3228_s23 = sadd.s32 4294967294, %s4319_s21   ;;  %s4319_s21 = sphi %s4362_s21, %s5592_s21   ;;  %s4315_s20 = sphi %s4360_s20, %s5591_s20   ;;  %s4311_s19 = sphi %s4358_s19, %s5590_s19   ;;  %s4307_s18 = sphi %s4356_s18, %s5589_s18  }
   0x4   : > { %s4381_s24 = sadd.s32 1, %s4319_s21   ;;  %s135_s25 = sadd.s32 1, %s4315_s20 }
   0x5   : > { %s132_s26 = ssub.s32 %s4319_s21, %s4381_s24  ;;  %p145_p0 = scmp.ne.s32.totalorder %s4315_s20, %s4311_s19 }
   0x6   : > { %p133_p1 = scmp.eq.s32.totalorder %s132_s26, 0  ;;  %p146_p2 = scmp.eq.s32.totalorder %s4377_s22, 1 }
   0x7   : > { %p151_p3 = scmp.ne.s32.totalorder %s4311_s19, %s4307_s18  ;;  %p152_p4 = scmp.eq.s32.totalorder %s3228_s23, 1 }
   0x8   : > { %s4392_s27 = scalar_select %p133_p1, %s4315_s20, %s135_s25  }
   0x9   : > { %p4394_p5 = por %p146_p2, %p145_p0  ;;  %p4398_p6 = por %p152_p4, %p151_p3 }
   0xa   : > { %p3231_p7 = scmp.ge.s32.totalorder %s4319_s21, 1  ;;  %p190_p8 = scmp.lt.s32.totalorder %s4319_s21, 3 }
   0xc   : > { %p191_p9 = pnand %p3231_p7, %p190_p8 }
   0xe   : > { %194 = sbr.rel (%p191_p9) target bundleno = 814 (0x32e), region = 40 }
  0x15   : > { %vm764_vm0 = vcmask 1040384   ;;  %vm765_vm1 = vcmask 1041408   ;;  %v3365_v0 = vld [vmem:[%s5502_s1 + $0x8] sm:$0x3]  ;;  %p217_p10 = scmp.lt.s32.totalorder %s4377_s22, 1  ;;  %v4321_v1 = vmov 65535  }
  0x16   : > { %v766_v2 = vsel %vm764_vm0, 4294967295, %v4321_v1  ;;  %v3233_v3 = vld [vmem:[%s5502_s1 + $0x2] sm:$0x3]  ;;  %v3384_v5 = vld [vmem:[%s5502_s1 + $0xa] sm:$0x3]  ;;  %vm715_vm4 = vcmask 23552  }
  0x17   : > { %v4411_v4 = vsel %vm765_vm1, %v766_v2, 0  ;;  %s218_s9 = scalar_select %p217_p10, %s4377_s22, 1  ;;  %v277_v9 = vld [vmem:[%s5502_s1] sm:$0x3]  ;;  %vm278_vm2 = vsmask.f32 3328 }
  0x18   : > { %5539 = vst [vmem:[#allocation5_spill] sm:$0xff] %v4411_v4  ;;  %v4418_v6 = vand.u32 %v3365_v0, %v4411_v4  ;;  %v769_v7 = vand.u32 %v3233_v3, %v4411_v4  ;;  %v4422_v8 = vand.u32 %v3384_v5, %v4411_v4  ;;  %v4428_v10 = vand.u32 %v4411_v4, %v277_v9  ;;  %v3402_v11 = vld [vmem:[%s5502_s1 + $0xc] sm:$0x3]  ;;  %v3314_v12 = vld [vmem:[%s5502_s1 + $0x4] sm:$0x3]  ;;  %s215_s23 = sand.u32 1, %s4311_s19  }
  0x19   : > { %s4192_s14 = smul.u32 216, %s218_s9  ;;  %vm279_vm3 = vsmask.f32 7440  ;;  %v3420_v13 = vld [vmem:[%s5502_s1 + $0xe] sm:$0x3]  ;;  %v4469_v25 = vand.u32 %v3402_v11, %v4411_v4  ;;  %v4472_v26 = vand.u32 %v3314_v12, %v4411_v4  ;;  %vm1240_vm6 = vcmask 1042432  }
  0x1a   : > { %5540 = vst [vmem:[#allocation6_spill] sm:$0xff] %v4418_v6  ;;  %3754 = vmatprep.subr.bf16.mxu0 %v4418_v6  ;;  %3618 = vmatprep.subr.bf16.mxu1 %v769_v7  ;;  %v4475_v27 = vand.u32 %v3420_v13, %v4411_v4  ;;  %vm4487_vm5 = vmor %vm278_vm2, %vm279_vm3  ;;  %vm1241_vm7 = vcmask 1046532   ;;  %vm4323_vm9 = vmmov 0   ;;  %vm3012_vm10 = vcmask 130048   ;;  %s3459_s30 = sshll.u32 %s4377_s22, 4  ;;  %s216_s6 = scalar_lea.vmem [#allocation2], %s215_s23 }
  0x1b   : > { %3755 = vmatpush3.bf16.msra.mxu0 %v4418_v6  ;;  %3619 = vmatpush3.bf16.msra.mxu1 %v769_v7  ;;  %s4435_s17 = scalar_lea.vmem %s5501_s0, %s4192_s14  ;;  %vm4709_vm8 = vmor %vm1240_vm6, %vm1241_vm7  ;;  %s3173_s7 = sshll.u32 %s216_s6, 4  ;;  %s5461_s7 = int_to_ptr.vmem [resolvable:$true] %s3173_s7 }
  0x1c   : > { %v4447_v14 = vld [vmem:[%s4435_s17] sm:$0xf]  ;;  %v4450_v15 = vld [vmem:[%s4435_s17 + $0x4] sm:$0xf]  ;;  %v225_v16 = vld [vmem:[%s4435_s17 + $0x8] sm:$0x1]  ;;  %3788 = vmatprep.subr.bf16.mxu0 %v4422_v8  ;;  %3652 = vmatprep.subr.bf16.mxu1 %v4428_v10  ;;  %s5459_s10 = scalar_lea.hbm %s5506_s5, %s3459_s30 }
  0x1d   : > { %v282_v17 = vshrl.u32 %v4447_v14, 16  ;;  %v285_v18 = vshll.u32 %v4447_v14, 16  ;;  %v291_v19 = vshll.u32 %v4450_v15, 16  ;;  %v295_v20 = vshrl.u32 %v4450_v15, 16  ;;  %v4460_v21 = vld [vmem:[%s4435_s17 + $0xc] sm:$0xf] }
  0x1e   : > { %v301_v22 = vshll.u32 %v225_v16, 16  ;;  %v4463_v23 = vld [vmem:[%s4435_s17 + $0x10] sm:$0xf]  ;;  %v4466_v24 = vld [vmem:[%s4435_s17 + $0x14] sm:$0x1]  ;;  %5541 = vst [vmem:[#allocation7_spill] sm:$0xff] %v4475_v27 }
  0x1f   : > { %v284_v28 = vrot.slane %v282_v17, 4  ;;  %v287_v29 = vrot.slane %v285_v18, 5  ;;  %v293_v30 = vrot.slane %v291_v19, 5  ;;  %v297_v31 = vrot.slane %v295_v20, 4  ;;  %v4483_v40 = vld [vmem:[%s4435_s17 + $0x18] sm:$0xf] }
  0x20   : > { %v303_v32 = vrot.slane %v301_v22, 5  ;;  %v306_v33 = vshrl.u32 %v4460_v21, 16  ;;  %v309_v34 = vshll.u32 %v4460_v21, 16  ;;  %v315_v35 = vshll.u32 %v4463_v23, 16  ;;  %v4496_v46 = vld [vmem:[%s4435_s17 + $0x1c] sm:$0xf] }
  0x21   : > { %v288_v36 = vor.u32 %v287_v29, %v284_v28  ;;  %v298_v37 = vor.u32 %v297_v31, %v293_v30  ;;  %v319_v38 = vshrl.u32 %v4463_v23, 16  ;;  %v325_v39 = vshll.u32 %v4466_v24, 16  ;;  %v4500_v53 = vld [vmem:[%s4435_s17 + $0x20] sm:$0x1]  ;;  %v4510_v0 = vld [vmem:[%s4435_s17 + $0x24] sm:$0xf] }
  0x22   : > { %v308_v42 = vrot.slane %v306_v33, 4  ;;  %v311_v43 = vrot.slane %v309_v34, 5  ;;  %v317_v44 = vrot.slane %v315_v35, 5  ;;  %v4493_v45 = vcombine.low %v4460_v21, %v4463_v23  ;;  %v4515_v7 = vld [vmem:[%s4435_s17 + $0x28] sm:$0xf]  ;;  %s3161_s11 = scalar_lea.sflag [#allocation3], %s215_s23 }
  0x23   : > { %v289_v47 = vrot.slane %v288_v36, 4  ;;  %v299_v48 = vrot.slane %v298_v37, 4  ;;  %v321_v49 = vrot.slane %v319_v38, 4  ;;  %v327_v50 = vrot.slane %v325_v39, 5  ;;  %v4523_v16 = vld [vmem:[%s4435_s17 + $0x2c] sm:$0x1] }
  0x24   : > { %v312_v51 = vor.u32 %v311_v43, %v308_v42  ;;  %v330_v54 = vshrl.u32 %v4483_v40, 16  ;;  %v333_v55 = vshll.u32 %v4483_v40, 16  ;;  %v339_v59 = vshll.u32 %v4496_v46, 16  ;;  %v4529_v22 = vld [vmem:[%s4435_s17 + $0x30] sm:$0xf]  ;;  %s4257_s12 = scalar_lea.vmem %s5461_s7, 16 }
  0x25   : > { %v294_v56 = vsel %vm4487_vm5, %v289_v47, %v293_v30  ;;  %v304_v57 = vsel %vm4487_vm5, %v299_v48, %v303_v32  ;;  %v322_v58 = vor.u32 %v321_v49, %v317_v44  ;;  %v343_v3 = vshrl.u32 %v4496_v46, 16  ;;  %v4536_v36 = vld [vmem:[%s4435_s17 + $0x34] sm:$0xf]  ;;  %v4543_v42 = vld [vmem:[%s4435_s17 + $0x38] sm:$0x1]  ;;  %p4258_p11 = scmp.ne.s32.totalorder %s5461_s7, %s4257_s12  ;;  %s4325_s22 = smov [#allocation2]  }
  0x26   : > { %v3234_v60 = vcombine.low %v294_v56, %v304_v57  ;;  %v313_v61 = vrot.slane %v312_v51, 4  ;;  %v332_v62 = vrot.slane %v330_v54, 4  ;;  %v335_v63 = vrot.slane %v333_v55, 5  ;;  %v4551_v56 = vld [vmem:[%s4435_s17 + $0x3c] sm:$0xf]  ;;  %s4261_s13 = sshll.u32 %s4325_s22, 4  ;;  %s4262_s13 = int_to_ptr.vmem [resolvable:$false] %s4261_s13 }
  0x27   : > { %v323_v1 = vrot.slane %v322_v58, 4  ;;  %v341_v2 = vrot.slane %v339_v59, 5  ;;  %v349_v5 = vshll.u32 %v4500_v53, 16  ;;  %v345_v18 = vrot.slane %v343_v3, 4  ;;  %p4259_p12 = pnand %p4258_p11, %p4394_p5  ;;  %s4263_s14 = scalar_lea.vmem %s4262_s13, 32 }
  0x28   : > { %3620 = vmatprep.mubr.msk.bf16.mxu1 %vm715_vm4, %v3234_v60  ;;  %v318_v9 = vsel %vm4487_vm5, %v313_v61, %v317_v44  ;;  %v336_v11 = vor.u32 %v335_v63, %v332_v62  ;;  %v354_v20 = vshrl.u32 %v4510_v0, 16  ;;  %v357_v30 = vshll.u32 %v4510_v0, 16  ;;  %v4558_v61 = vld [vmem:[%s4435_s17 + $0x40] sm:$0xf]  ;;  %p4264_p0 = scmp.lt.s32.totalorder %s5461_s7, %s4262_s13  ;;  %p4265_p1 = scmp.lt.s32.totalorder %s4263_s14, %s4257_s12 }
  0x29   : > { %v328_v17 = vsel %vm4487_vm5, %v323_v1, %v327_v50  ;;  %v351_v19 = vrot.slane %v349_v5, 5  ;;  %v363_v31 = vshll.u32 %v4515_v7, 16  ;;  %v346_v32 = vor.u32 %v345_v18, %v341_v2  ;;  %v4570_v18 = vld [vmem:[%s4435_s17 + $0x44] sm:$0x1]  ;;  %p4260_p13 = pneg %p4259_p12 }
  0x2a   : > { %v3235_v28 = vcombine.low %v318_v9, %v328_v17  ;;  %v337_v29 = vrot.slane %v336_v11, 4  ;;  %v356_v33 = vrot.slane %v354_v20, 4  ;;  %v367_v34 = vshrl.u32 %v4515_v7, 16  ;;  %p4266_p2 = por %p4265_p1, %p4264_p0 }
  0x2b   : > { %v373_v35 = vshll.u32 %v4523_v16, 16  ;;  %v359_v38 = vrot.slane %v357_v30, 5  ;;  %v365_v39 = vrot.slane %v363_v31, 5  ;;  %v378_v43 = vshrl.u32 %v4529_v22, 16 }
  0x2c   : > { %3756 = vmatprep.mubr.msk.bf16.mxu0 %vm715_vm4, %v3235_v28  ;;  %3621 = vmatmul.mubr.msk.bf16.vlgmr.msra.gmra.mrb[0].mxu1 %vm715_vm4, %v3235_v28  ;;  %v342_v37 = vsel %vm4487_vm5, %v337_v29, %v341_v2  ;;  %v347_v44 = vrot.slane %v346_v32, 4  ;;  %v369_v47 = vrot.slane %v367_v34, 4  ;;  %v381_v49 = vshll.u32 %v4529_v22, 16  ;;  %v4575_v28 = vld [vmem:[%s4435_s17 + $0x48] sm:$0xf]  ;;  %p4267_p3 = pnand %p4266_p2, %p4260_p13 }
  0x2d   : > { %v375_v48 = vrot.slane %v373_v35, 5  ;;  %3653 = vmatpush3.bf16.msra.mxu1 %v4428_v10  ;;  %v360_v50 = vor.u32 %v359_v38, %v356_v33  ;;  %v380_v51 = vrot.slane %v378_v43, 4  ;;  %v387_v54 = vshll.u32 %v4536_v36, 16  ;;  %v4582_v33 = vld [vmem:[%s4435_s17 + $0x4c] sm:$0xf] }
  0x2e   : > { %v391_v55 = vshrl.u32 %v4536_v36, 16  ;;  %3686 = vmatprep.subr.bf16.mxu1 %v4472_v26  ;;  %v352_v57 = vsel %vm4487_vm5, %v347_v44, %v351_v19  ;;  %v370_v58 = vor.u32 %v369_v47, %v365_v39  ;;  %v383_v59 = vrot.slane %v381_v49, 5  ;;  %v4598_v49 = vld [vmem:[%s4435_s17 + $0x50] sm:$0x1] }
  0x2f   : > { %v397_v60 = vshll.u32 %v4543_v42, 16  ;;  %v4560_v10 = vcombine.low %v342_v37, %v352_v57  ;;  %v361_v62 = vrot.slane %v360_v50, 4  ;;  %v389_v63 = vrot.slane %v387_v54, 5  ;;  %v4603_v54 = vld [vmem:[%s4435_s17 + $0x54] sm:$0xf] }
  0x30   : > { %v393_v1 = vrot.slane %v391_v55, 4  ;;  %v371_v2 = vrot.slane %v370_v58, 4  ;;  %v384_v3 = vor.u32 %v383_v59, %v380_v51  ;;  %v402_v9 = vshrl.u32 %v4551_v56, 16 }
  0x31   : > { %5544 = vst [vmem:[#allocation8_spill] sm:$0xff] %v4560_v10  ;;  %v399_v5 = vrot.slane %v397_v60, 5  ;;  %3757 = vmatmul.mubr.msk.bf16.vlgmr.msra.gmra.mrb[0].mxu0 %vm715_vm4, %v4560_v10  ;;  %3624 = vmatprep.mubr.msk.bf16.mxu1 %vm715_vm4, %v4560_v10  ;;  %v366_v11 = vsel %vm4487_vm5, %v361_v62, %v365_v39  ;;  %v405_v19 = vshll.u32 %v4551_v56, 16  ;;  %v411_v20 = vshll.u32 %v4558_v61, 16  ;;  %v4608_v60 = vld [vmem:[%s4435_s17 + $0x58] sm:$0xf] }
  0x32   : > { %v394_v17 = vor.u32 %v393_v1, %v389_v63  ;;  %3789 = vmatpush3.bf16.msra.mxu0 %v4422_v8  ;;  %v376_v29 = vsel %vm4487_vm5, %v371_v2, %v375_v48  ;;  %v385_v30 = vrot.slane %v384_v3, 4  ;;  %v404_v31 = vrot.slane %v402_v9, 4 }
  0x33   : > { %v415_v32 = vshrl.u32 %v4558_v61, 16  ;;  %v4584_v34 = vcombine.low %v366_v11, %v376_v29  ;;  %v407_v37 = vrot.slane %v405_v19, 5  ;;  %v413_v38 = vrot.slane %v411_v20, 5  ;;  %3822 = vmatprep.subr.bf16.mxu0 %v4469_v25  ;;  %v4621_v29 = vld [vmem:[%s4435_s17 + $0x5c] sm:$0x1] }
  0x34   : > { %v395_v35 = vrot.slane %v394_v17, 4  ;;  %v390_v8 = vsel %vm4487_vm5, %v385_v30, %v389_v63  ;;  %v421_v43 = vshll.u32 %v4570_v18, 16  ;;  %v426_v44 = vshrl.u32 %v4575_v28, 16 }
  0x35   : > { %5545 = vst [vmem:[#allocation9_spill] sm:$0xff] %v4584_v34  ;;  %v417_v39 = vrot.slane %v415_v32, 4  ;;  %3760 = vmatprep.mubr.msk.bf16.mxu0 %vm715_vm4, %v4584_v34  ;;  %3625 = vmatmul.mubr.msk.bf16.gmra.mrb[4].mxu1 %vm715_vm4, %v4584_v34  ;;  %v408_v48 = vor.u32 %v407_v37, %v404_v31  ;;  %v429_v50 = vshll.u32 %v4575_v28, 16  ;;  %v435_v51 = vshll.u32 %v4582_v33, 16  ;;  %v4625_v31 = vld [vmem:[%s4435_s17 + $0x60] sm:$0xf] }
  0x36   : > { %v400_v47 = vsel %vm4487_vm5, %v395_v35, %v399_v5  ;;  %v423_v58 = vrot.slane %v421_v43, 5  ;;  %v428_v59 = vrot.slane %v426_v44, 4  ;;  %v439_v2 = vshrl.u32 %v4582_v33, 16 }
  0x37   : > { %v4605_v55 = vcombine.low %v390_v8, %v400_v47  ;;  %v418_v57 = vor.u32 %v417_v39, %v413_v38  ;;  %v409_v62 = vrot.slane %v408_v48, 4  ;;  %v431_v63 = vrot.slane %v429_v50, 5  ;;  %v4630_v39 = vld [vmem:[%s4435_s17 + $0x64] sm:$0xf] }
  0x38   : > { %v437_v1 = vrot.slane %v435_v51, 5  ;;  %v445_v5 = vshll.u32 %v4598_v49, 16  ;;  %v450_v9 = vshrl.u32 %v4603_v54, 16  ;;  %v453_v11 = vshll.u32 %v4603_v54, 16 }
  0x39   : > { %5546 = vst [vmem:[#allocation10_spill] sm:$0xff] %v4605_v55  ;;  %3628 = vmatprep.mubr.msk.bf16.mxu1 %vm715_vm4, %v4605_v55  ;;  %v419_v3 = vrot.slane %v418_v57, 4  ;;  %3761 = vmatmul.mubr.msk.bf16.gmra.mrb[4].mxu0 %vm715_vm4, %v4605_v55  ;;  %v414_v17 = vsel %vm4487_vm5, %v409_v62, %v413_v38  ;;  %v432_v19 = vor.u32 %v431_v63, %v428_v59  ;;  %v441_v20 = vrot.slane %v439_v2, 4  ;;  %v4644_v62 = vld [vmem:[%s4435_s17 + $0x68] sm:$0x1] }
  0x3a   : > { %v459_v30 = vshll.u32 %v4608_v60, 16  ;;  %v447_v35 = vrot.slane %v445_v5, 5  ;;  %v452_v37 = vrot.slane %v450_v9, 4  ;;  %v455_v8 = vrot.slane %v453_v11, 5 }
  0x3b   : > { %v424_v32 = vsel %vm4487_vm5, %v419_v3, %v423_v58  ;;  %v433_v38 = vrot.slane %v432_v19, 4  ;;  %v442_v44 = vor.u32 %v441_v20, %v437_v1  ;;  %v463_v50 = vshrl.u32 %v4608_v60, 16 }
  0x3c   : > { %v4632_v43 = vcombine.low %v414_v17, %v424_v32  ;;  %v461_v47 = vrot.slane %v459_v30, 5  ;;  %v456_v48 = vor.u32 %v455_v8, %v452_v37  ;;  %v469_v51 = vshll.u32 %v4621_v29, 16  ;;  %v4649_v17 = vld [vmem:[%s4435_s17 + $0x6c] sm:$0xf]  ;;  %v4655_v32 = vld [vmem:[%s4435_s17 + $0x70] sm:$0xf] }
  0x3d   : > { %v474_v57 = vshrl.u32 %v4625_v31, 16  ;;  %v438_v58 = vsel %vm4487_vm5, %v433_v38, %v437_v1  ;;  %v443_v59 = vrot.slane %v442_v44, 4  ;;  %v477_v63 = vshll.u32 %v4625_v31, 16 }
  0x3e   : > { %5547 = vst [vmem:[#allocation11_spill] sm:$0xff] %v4632_v43  ;;  %3764 = vmatprep.mubr.msk.bf16.mxu0 %vm715_vm4, %v4632_v43  ;;  %3629 = vmatmul.mubr.msk.bf16.gmra.mrb[8].mxu1 %vm715_vm4, %v4632_v43  ;;  %v483_v2 = vshll.u32 %v4630_v39, 16  ;;  %v457_v3 = vrot.slane %v456_v48, 4  ;;  %v465_v5 = vrot.slane %v463_v50, 4  ;;  %v471_v9 = vrot.slane %v469_v51, 5 }
  0x3f   : > { %v476_v11 = vrot.slane %v474_v57, 4  ;;  %v448_v1 = vsel %vm4487_vm5, %v443_v59, %v447_v35  ;;  %v479_v19 = vrot.slane %v477_v63, 5  ;;  %v487_v30 = vshrl.u32 %v4630_v39, 16  ;;  %v4663_v51 = vld [vmem:[%s4435_s17 + $0x74] sm:$0x1] }
  0x40   : > { %v485_v20 = vrot.slane %v483_v2, 5  ;;  %v4657_v37 = vcombine.low %v438_v58, %v448_v1  ;;  %v462_v8 = vsel %vm4487_vm5, %v457_v3, %v461_v47  ;;  %v466_v38 = vor.u32 %v465_v5, %v461_v47  ;;  %v4674_v1 = vld [vmem:[%s4435_s17 + $0x78] sm:$0xf] }
  0x41   : > { %v493_v44 = vshll.u32 %v4644_v62, 16  ;;  %v480_v48 = vor.u32 %v479_v19, %v476_v11  ;;  %v489_v50 = vrot.slane %v487_v30, 4  ;;  %v498_v35 = vshrl.u32 %v4649_v17, 16 }
  0x42   : > { %5548 = vst [vmem:[#allocation12_spill] sm:$0xff] %v4657_v37  ;;  %v501_v57 = vshll.u32 %v4649_v17, 16  ;;  %3765 = vmatmul.mubr.msk.bf16.gmra.mrb[8].mxu0 %vm715_vm4, %v4657_v37  ;;  %3632 = vmatprep.mubr.msk.bf16.mxu1 %vm715_vm4, %v4657_v37  ;;  %v467_v58 = vrot.slane %v466_v38, 4  ;;  %v507_v59 = vshll.u32 %v4655_v32, 16  ;;  %v511_v63 = vshrl.u32 %v4655_v32, 16 }
  0x43   : > { %v495_v47 = vrot.slane %v493_v44, 5  ;;  %v481_v2 = vrot.slane %v480_v48, 4  ;;  %v490_v3 = vor.u32 %v489_v50, %v485_v20  ;;  %v500_v5 = vrot.slane %v498_v35, 4  ;;  %v4680_v38 = vld [vmem:[%s4435_s17 + $0x7c] sm:$0xf] }
  0x44   : > { %v503_v11 = vrot.slane %v501_v57, 5  ;;  %v472_v19 = vsel %vm4487_vm5, %v467_v58, %v471_v9  ;;  %v509_v30 = vrot.slane %v507_v59, 5  ;;  %v513_v13 = vrot.slane %v511_v63, 4  ;;  %v4687_v37 = vld [vmem:[%s4435_s17 + $0x80] sm:$0x1] }
  0x45   : > { %v517_v12 = vshll.u32 %v4663_v51, 16  ;;  %v4682_v44 = vcombine.low %v462_v8, %v472_v19  ;;  %v486_v48 = vsel %vm4487_vm5, %v481_v2, %v485_v20  ;;  %v491_v52 = vrot.slane %v490_v3, 4 }
  0x46   : > { %v504_v50 = vor.u32 %v503_v11, %v500_v5  ;;  %v514_v35 = vor.u32 %v513_v13, %v509_v30  ;;  %v522_v9 = vshrl.u32 %v4674_v1, 16  ;;  %v525_v58 = vshll.u32 %v4674_v1, 16  ;;  %v4702_v5 = vld [vmem:[%s4435_s17 + $0x84] sm:$0xf] }
  0x47   : > { %5549 = vst [vmem:[#allocation13_spill] sm:$0xff] %v4682_v44  ;;  %v519_v57 = vrot.slane %v517_v12, 5  ;;  %3768 = vmatprep.mubr.msk.bf16.mxu0 %vm715_vm4, %v4682_v44  ;;  %3633 = vmatmul.mubr.msk.bf16.gmra.mrb[12].mxu1 %vm715_vm4, %v4682_v44  ;;  %v496_v20 = vsel %vm4487_vm5, %v491_v52, %v495_v47  ;;  %v531_v59 = vshll.u32 %v4680_v38, 16  ;;  %v535_v12 = vshrl.u32 %v4680_v38, 16 }
  0x48   : > { %v505_v8 = vrot.slane %v504_v50, 4  ;;  %v4699_v13 = vcombine.low %v486_v48, %v496_v20  ;;  %v515_v63 = vrot.slane %v514_v35, 4  ;;  %v524_v2 = vrot.slane %v522_v9, 4  ;;  %v4722_v9 = vld [vmem:[%s4435_s17 + $0x88] sm:$0xf] }
  0x49   : > { %v527_v3 = vrot.slane %v525_v58, 5  ;;  %v533_v19 = vrot.slane %v531_v59, 5  ;;  %v537_v44 = vrot.slane %v535_v12, 4  ;;  %v541_v52 = vshll.u32 %v4687_v37, 16  ;;  %v4727_v59 = vld [vmem:[%s4435_s17 + $0x8c] sm:$0x1] }
  0x4a   : > { %5550 = vst [vmem:[#allocation14_spill] sm:$0xff] %v4699_v13  ;;  %v510_v11 = vsel %vm4487_vm5, %v505_v8, %v509_v30  ;;  %3769 = vmatmul.mubr.msk.bf16.gmra.mrb[12].mxu0 %vm715_vm4, %v4699_v13  ;;  %3636 = vmatprep.mubr.msk.bf16.mxu1 %vm715_vm4, %v4699_v13  ;;  %v520_v48 = vsel %vm4487_vm5, %v515_v63, %v519_v57  ;;  %v3299_v50 = vrot.slane %v4460_v21, 9  ;;  %v1252_v35 = vrot.slane %v4463_v23, 5 }
  0x4b   : > { %v528_v30 = vor.u32 %v527_v3, %v524_v2  ;;  %v4724_v58 = vcombine.low %v510_v11, %v520_v48  ;;  %v538_v20 = vor.u32 %v537_v44, %v533_v19  ;;  %v543_v8 = vrot.slane %v541_v52, 5 }
  0x4c   : > { %v546_v12 = vshrl.u32 %v4702_v5, 16  ;;  %v1253_v57 = vsel %vm4709_vm8, %v3299_v50, %v1252_v35  ;;  %v1254_v63 = vrot.slane %v1252_v35, 4  ;;  %v549_v21 = vshll.u32 %v4702_v5, 16  ;;  %v4745_v35 = vld [vmem:[%s4435_s17 + $0x90] sm:$0xf] }
  0x4d   : > { %5553 = vst [vmem:[#allocation15_spill] sm:$0xff] %v4724_v58  ;;  %v529_v13 = vrot.slane %v528_v30, 4  ;;  %3772 = vmatprep.mubr.msk.bf16.mxu0 %vm715_vm4, %v4724_v58  ;;  %v539_v23 = vrot.slane %v538_v20, 4  ;;  %v555_v44 = vshll.u32 %v4722_v9, 16  ;;  %v559_v3 = vshrl.u32 %v4722_v9, 16 }
  0x4e   : > { %v548_v2 = vrot.slane %v546_v12, 4  ;;  %v5554_v52 = vrot.slane %v4466_v24, 5  ;;  %v551_v30 = vrot.slane %v549_v21, 5  ;;  %v565_v50 = vshll.u32 %v4727_v59, 16  ;;  %v4754_v24 = vld [vmem:[%s4435_s17 + $0x94] sm:$0xf] }
  0x4f   : > { %v534_v11 = vsel %vm4487_vm5, %v529_v13, %v533_v19  ;;  %3637 = vmatmul.mubr.msk.bf16.gmra.mrb[16].mxu1 %vm715_vm4, %v4724_v58  ;;  %v544_v20 = vsel %vm4487_vm5, %v539_v23, %v543_v8  ;;  %v557_v13 = vrot.slane %v555_v44, 5  ;;  %v561_v19 = vrot.slane %v559_v3, 4  ;;  %v4772_v44 = vld [vmem:[%s4435_s17 + $0x98] sm:$0x1] }
  0x50   : > { %v1256_v48 = vsel %vm4709_vm8, %v1254_v63, %v5554_v52  ;;  %v4756_v43 = vcombine.low %v534_v11, %v544_v20  ;;  %v552_v63 = vor.u32 %v551_v30, %v548_v2  ;;  %v567_v21 = vrot.slane %v565_v50, 5 }
  0x51   : > { %v4751_v12 = vcombine.low %v1253_v57, %v1256_v48  ;;  %v3300_v52 = vrot.slane %v4483_v40, 9  ;;  %v562_v55 = vor.u32 %v561_v19, %v557_v13  ;;  %v5557_v34 = vrot.slane %v4496_v46, 5 }
  0x52   : > { %5556 = vst [vmem:[#allocation17_spill] sm:$0xff] %v4756_v43  ;;  %v570_v10 = vshrl.u32 %v4745_v35, 16  ;;  %v573_v8 = vshll.u32 %v4745_v35, 16  ;;  %3773 = vmatmul.mubr.msk.bf16.gmra.mrb[16].mxu0 %vm715_vm4, %v4756_v43  ;;  %3640 = vmatprep.mubr.msk.bf16.mxu1 %vm715_vm4, %v4756_v43  ;;  %v553_v57 = vrot.slane %v552_v63, 4  ;;  %v583_v3 = vshrl.u32 %v4754_v24, 16 }
  0x53   : > { %5555 = vst [vmem:[#allocation16_spill] sm:$0xff] %v4751_v12  ;;  %v1261_v58 = vrot.slane %v5557_v34, 4  ;;  %v5558_v23 = vmov %v5557_v34  ;;  %v579_v34 = vshll.u32 %v4754_v24, 16  ;;  %3790 = vmatprep.mubr.msk.bf16.mxu0 %vm715_vm4, %v4751_v12  ;;  %v563_v11 = vrot.slane %v562_v55, 4  ;;  %v4787_v43 = vld [vmem:[%s4435_s17 + $0x9c] sm:$0xf] }
  0x54   : > { %v1260_v2 = vsel %vm4709_vm8, %v3300_v52, %v5558_v23  ;;  %v5559_v48 = vrot.slane %v4500_v53, 5  ;;  %v572_v50 = vrot.slane %v570_v10, 4  ;;  %v575_v20 = vrot.slane %v573_v8, 5  ;;  %v4794_v10 = vld [vmem:[%s4435_s17 + $0xa0] sm:$0xf] }
  0x55   : > { %v558_v19 = vsel %vm4487_vm5, %v553_v57, %v557_v13  ;;  %v581_v52 = vrot.slane %v579_v34, 5  ;;  %v585_v23 = vrot.slane %v583_v3, 4  ;;  %v568_v55 = vsel %vm4487_vm5, %v563_v11, %v567_v21 }
  0x56   : > { %v1263_v30 = vsel %vm4709_vm8, %v1261_v58, %v5559_v48  ;;  %v576_v6 = vor.u32 %v575_v20, %v572_v50  ;;  %v589_v53 = vshll.u32 %v4772_v44, 16  ;;  %v3301_v58 = vrot.slane %v4510_v0, 9  ;;  %v4801_v48 = vld [vmem:[%s4435_s17 + $0xa4] sm:$0x1] }
  0x57   : > { %v4784_v63 = vcombine.low %v1260_v2, %v1263_v30  ;;  %v4796_v8 = vcombine.low %v558_v19, %v568_v55  ;;  %v586_v13 = vor.u32 %v585_v23, %v581_v52  ;;  %v1266_v57 = vrot.slane %v4515_v7, 5 }
  0x58   : > { %v1269_v2 = vrot.slane %v4523_v16, 5  ;;  %v577_v34 = vrot.slane %v576_v6, 4  ;;  %v591_v3 = vrot.slane %v589_v53, 5  ;;  %v594_v21 = vshrl.u32 %v4787_v43, 16 }
  0x59   : > { %5560 = vst [vmem:[#allocation18_spill] sm:$0xff] %v4784_v63  ;;  %5561 = vst [vmem:[#allocation19_spill] sm:$0xff] %v4796_v8  ;;  %v597_v11 = vshll.u32 %v4787_v43, 16  ;;  %3641 = vmatmul.mubr.msk.bf16.gmra.mrb[20].mxu1 %vm715_vm4, %v4796_v8  ;;  %v587_v30 = vrot.slane %v586_v13, 4  ;;  %v1267_v50 = vsel %vm4709_vm8, %v3301_v58, %v1266_v57  ;;  %v1268_v20 = vrot.slane %v1266_v57, 4 }
  0x5a   : > { %v603_v19 = vshll.u32 %v4794_v10, 16  ;;  %v582_v6 = vsel %vm4487_vm5, %v577_v34, %v581_v52  ;;  %v596_v16 = vrot.slane %v594_v21, 4  ;;  %v607_v55 = vshrl.u32 %v4794_v10, 16  ;;  %3791 = vmatmul.mubr.msk.bf16.vlgmr.msra.gmra.mrb[0].mxu0 %vm715_vm4, %v4784_v63  ;;  %v4821_v8 = vld [vmem:[%s4435_s17 + $0xa8] sm:$0xf] }
  0x5b   : > { %v599_v23 = vrot.slane %v597_v11, 5  ;;  %v592_v53 = vsel %vm4487_vm5, %v587_v30, %v591_v3  ;;  %v1270_v58 = vsel %vm4709_vm8, %v1268_v20, %v1269_v2  ;;  %v613_v57 = vshll.u32 %v4801_v48, 16  ;;  %5562 = vst [vmem:[#allocation20_spill] sm:$0xff] %v4821_v8  ;;  %3823 = vmatpush3.bf16.msra.mxu0 %v4469_v25  ;;  %v4829_v63 = vld [vmem:[%s4435_s17 + $0xac] sm:$0xf] }
  0x5c   : > { %v605_v13 = vrot.slane %v603_v19, 5  ;;  %v4824_v52 = vcombine.low %v582_v6, %v592_v53  ;;  %v4826_v34 = vcombine.low %v1267_v50, %v1270_v58  ;;  %v609_v11 = vrot.slane %v607_v55, 4  ;;  %3856 = vmatprep.subr.bf16.mxu0 %v4475_v27  ;;  %v4840_v19 = vld [vmem:[%s4435_s17 + $0xb0] sm:$0x1] }
  0x5d   : > { %v600_v21 = vor.u32 %v599_v23, %v596_v16  ;;  %v615_v3 = vrot.slane %v613_v57, 5  ;;  %v3302_v30 = vrot.slane %v4529_v22, 9  ;;  %v1273_v2 = vrot.slane %v4536_v36, 5  ;;  %5565 = vst [vmem:[#allocation23_spill] sm:$0xff] %v4840_v19 }
  0x5e   : > { %5563 = vst [vmem:[#allocation21_spill] sm:$0xff] %v4824_v52  ;;  %5564 = vst [vmem:[#allocation22_spill] sm:$0xff] %v4826_v34  ;;  %v1276_v20 = vrot.slane %v4543_v42, 5  ;;  %3644 = vmatprep.mubr.msk.bf16.mxu1 %vm715_vm4, %v4824_v52  ;;  %3794 = vmatprep.mubr.msk.bf16.mxu0 %vm715_vm4, %v4826_v34  ;;  %v610_v50 = vor.u32 %v609_v11, %v605_v13  ;;  %v618_v6 = vshrl.u32 %v4821_v8, 16  ;;  %v621_v16 = vshll.u32 %v4821_v8, 16 }
  0x5f   : > { %v601_v25 = vrot.slane %v600_v21, 4  ;;  %v1274_v42 = vsel %vm4709_vm8, %v3302_v30, %v1273_v2  ;;  %v1275_v23 = vrot.slane %v1273_v2, 4  ;;  %v627_v55 = vshll.u32 %v4829_v63, 16  ;;  %v4854_v2 = vld [vmem:[%s4435_s17 + $0xb4] sm:$0xf] }
  0x60   : > { %v631_v53 = vshrl.u32 %v4829_v63, 16  ;;  %v611_v57 = vrot.slane %v610_v50, 4  ;;  %v620_v21 = vrot.slane %v618_v6, 4  ;;  %v623_v11 = vrot.slane %v621_v16, 5 }
  0x61   : > { %v606_v58 = vsel %vm4487_vm5, %v601_v25, %v605_v13  ;;  %v1277_v52 = vsel %vm4709_vm8, %v1275_v23, %v1276_v20  ;;  %v629_v34 = vrot.slane %v627_v55, 5  ;;  %v637_v30 = vshll.u32 %v4840_v19, 16  ;;  %v4862_v25 = vld [vmem:[%s4435_s17 + $0xb8] sm:$0xf] }
  0x62   : > { %v633_v12 = vrot.slane %v631_v53, 4  ;;  %v616_v27 = vsel %vm4487_vm5, %v611_v57, %v615_v3  ;;  %v4858_v4 = vcombine.low %v1274_v42, %v1277_v52  ;;  %v624_v8 = vor.u32 %v623_v11, %v620_v21  ;;  %v4871_v3 = vld [vmem:[%s4435_s17 + $0xbc] sm:$0x1] }
  0x63   : > { %v3303_v13 = vrot.slane %v4551_v56, 9  ;;  %v4864_v50 = vcombine.low %v606_v58, %v616_v27  ;;  %v639_v6 = vrot.slane %v637_v30, 5  ;;  %v1280_v16 = vrot.slane %v4558_v61, 5 }
  0x64   : > { %5566 = vst [vmem:[#allocation24_spill] sm:$0xff] %v4858_v4  ;;  %v634_v20 = vor.u32 %v633_v12, %v629_v34  ;;  %3795 = vmatmul.mubr.msk.bf16.gmra.mrb[4].mxu0 %vm715_vm4, %v4858_v4  ;;  %v625_v23 = vrot.slane %v624_v8, 4  ;;  %v1283_v55 = vrot.slane %v4570_v18, 5  ;;  %v642_v52 = vshrl.u32 %v4854_v2, 16 }
  0x65   : > { %5567 = vst [vmem:[#allocation25_spill] sm:$0xff] %v4864_v50  ;;  %v645_v42 = vshll.u32 %v4854_v2, 16  ;;  %3645 = vmatmul.mubr.msk.bf16.gmra.mrb[24].mxu1 %vm715_vm4, %v4864_v50  ;;  %v1281_v12 = vsel %vm4709_vm8, %v3303_v13, %v1280_v16  ;;  %v1282_v53 = vrot.slane %v1280_v16, 4  ;;  %v651_v58 = vshll.u32 %v4862_v25, 16 }
  0x66   : > { %v635_v27 = vrot.slane %v634_v20, 4  ;;  %v630_v8 = vsel %vm4487_vm5, %v625_v23, %v629_v34  ;;  %v644_v18 = vrot.slane %v642_v52, 4  ;;  %v655_v21 = vshrl.u32 %v4862_v25, 16 }
  0x67   : > { %v647_v57 = vrot.slane %v645_v42, 5  ;;  %v1284_v30 = vsel %vm4709_vm8, %v1282_v53, %v1283_v55  ;;  %v653_v20 = vrot.slane %v651_v58, 5  ;;  %v661_v50 = vshll.u32 %v4871_v3, 16 }
  0x68   : > { %v640_v11 = vsel %vm4487_vm5, %v635_v27, %v639_v6  ;;  %v4890_v16 = vcombine.low %v1281_v12, %v1284_v30  ;;  %v657_v19 = vrot.slane %v655_v21, 4  ;;  %v3304_v23 = vrot.slane %v4575_v28, 9 }
  0x69   : > { %v4888_v13 = vcombine.low %v630_v8, %v640_v11  ;;  %v648_v4 = vor.u32 %v647_v57, %v644_v18  ;;  %v663_v34 = vrot.slane %v661_v50, 5  ;;  %v1287_v52 = vrot.slane %v4582_v33, 5 }
  0x6a   : > { %v1290_v42 = vrot.slane %v4598_v49, 5  ;;  %3798 = vmatprep.mubr.msk.bf16.mxu0 %vm715_vm4, %v4890_v16  ;;  %v658_v55 = vor.u32 %v657_v19, %v653_v20  ;;  %v3305_v27 = vrot.slane %v4603_v54, 9  ;;  %v1294_v12 = vrot.slane %v4608_v60, 5 }
  0x6b   : > { %3648 = vmatprep.mubr.msk.bf16.mxu1 %vm715_vm4, %v4888_v13  ;;  %v649_v6 = vrot.slane %v648_v4, 4  ;;  %v1288_v50 = vsel %vm4709_vm8, %v3304_v23, %v1287_v52  ;;  %v1289_v53 = vrot.slane %v1287_v52, 4  ;;  %v3266_v58 = vcombine.low %v4447_v14, %v4450_v15 }
  0x6c   : > { %v1297_v49 = vrot.slane %v4621_v29, 5  ;;  %v659_v18 = vrot.slane %v658_v55, 4  ;;  %v1295_v4 = vsel %vm4709_vm8, %v3305_v27, %v1294_v12  ;;  %v1296_v19 = vrot.slane %v1294_v12, 4 }
  0x6d   : > { %v654_v8 = vsel %vm4487_vm5, %v649_v6, %v653_v20  ;;  %v1291_v57 = vsel %vm4709_vm8, %v1289_v53, %v1290_v42  ;;  %v3306_v21 = vrot.slane %v4625_v31, 9  ;;  %v1301_v11 = vrot.slane %v4630_v39, 5 }
  0x6e   : > { %v1304_v30 = vrot.slane %v4644_v62, 5  ;;  %v664_v14 = vsel %vm4487_vm5, %v659_v18, %v663_v34  ;;  %v4917_v15 = vcombine.low %v1288_v50, %v1291_v57  ;;  %v1298_v29 = vsel %vm4709_vm8, %v1296_v19, %v1297_v49 }
  0x6f   : > { %v3307_v20 = vrot.slane %v4649_v17, 9  ;;  %v4922_v23 = vcombine.low %v654_v8, %v664_v14  ;;  %v4924_v52 = vcombine.low %v1295_v4, %v1298_v29  ;;  %v1303_v42 = vrot.slane %v1301_v11, 4 }
  0x70   : > { %3799 = vmatmul.mubr.msk.bf16.gmra.mrb[8].mxu0 %vm715_vm4, %v4917_v15  ;;  %v1308_v62 = vrot.slane %v4655_v32, 5  ;;  %v1311_v6 = vrot.slane %v4663_v51, 5  ;;  %v1302_v34 = vsel %vm4709_vm8, %v3306_v21, %v1301_v11  ;;  %v1315_v27 = vrot.slane %v4680_v38, 5 }
  0x71   : > { %3649 = vmatmul.mubr.msk.bf16.gmra.mrb[28].mxu1 %vm715_vm4, %v4922_v23  ;;  %3802 = vmatprep.mubr.msk.bf16.mxu0 %vm715_vm4, %v4924_v52  ;;  %v1305_v55 = vsel %vm4709_vm8, %v1303_v42, %v1304_v30  ;;  %v1322_v50 = vrot.slane %v4722_v9, 5  ;;  %v3308_v18 = vrot.slane %v4674_v1, 9  ;;  %v1318_v19 = vrot.slane %v4687_v37, 5 }
  0x72   : > { %3654 = vmatprep.mubr.msk.bf16.mxu1 %vm715_vm4, %v3266_v58  ;;  %v1309_v12 = vsel %vm4709_vm8, %v3307_v20, %v1308_v62  ;;  %v1310_v51 = vrot.slane %v1308_v62, 4  ;;  %v4943_v53 = vcombine.low %v1302_v34, %v1305_v55  ;;  %v1317_v4 = vrot.slane %v1315_v27, 4 }
  0x73   : > { %v4953_v58 = vcombine.low %v4483_v40, %v4496_v46  ;;  %v3309_v57 = vrot.slane %v4702_v5, 9  ;;  %v1324_v21 = vrot.slane %v1322_v50, 4  ;;  %v1325_v11 = vrot.slane %v4727_v59, 5 }
  0x74   : > { %v1312_v49 = vsel %vm4709_vm8, %v1310_v51, %v1311_v6  ;;  %v1329_v30 = vrot.slane %v4754_v24, 5  ;;  %v4962_v14 = vcombine.low %v4603_v54, %v4608_v60  ;;  %v1316_v40 = vsel %vm4709_vm8, %v3308_v18, %v1315_v27  ;;  %v5570_v51 = vld [vmem:[#allocation23_spill] sm:$0xff] }
  0x75   : > { %v4947_v8 = vcombine.low %v1309_v12, %v1312_v49  ;;  %v1319_v46 = vsel %vm4709_vm8, %v1317_v4, %v1318_v19  ;;  %v1323_v37 = vsel %vm4709_vm8, %v3309_v57, %v1322_v50  ;;  %v1326_v54 = vsel %vm4709_vm8, %v1324_v21, %v1325_v11  ;;  %v5066_v21 = vld [vmem:[%s4435_s17 + $0xc4] sm:$0xf] }
  0x76   : > { %v1336_v60 = vrot.slane %v4794_v10, 5  ;;  %v4982_v59 = vcombine.low %v4625_v31, %v4630_v39  ;;  %v4986_v29 = vcombine.low %v4510_v0, %v4515_v7  ;;  %v4990_v20 = vcombine.low %v4649_v17, %v4655_v32  ;;  %v3347_v32 = vld [vmem:[%s5502_s1 + $0x6] sm:$0x3] }
  0x77   : > { %v4992_v42 = vcombine.low %v1316_v40, %v1319_v46  ;;  %v4996_v62 = vcombine.low %v4529_v22, %v4536_v36  ;;  %v1331_v6 = vrot.slane %v1329_v30, 4  ;;  %v4999_v34 = vcombine.low %v1323_v37, %v1326_v54 }
  0x78   : > { %3803 = vmatmul.mubr.msk.bf16.gmra.mrb[12].mxu0 %vm715_vm4, %v4943_v53  ;;  %v1332_v31 = vrot.slane %v4772_v44, 5  ;;  %v3311_v0 = vrot.slane %v4787_v43, 9  ;;  %v1339_v7 = vrot.slane %v4801_v48, 5  ;;  %v1338_v39 = vrot.slane %v1336_v60, 4 }
  0x79   : > { %3655 = vmatmul.mubr.msk.bf16.vlgmr.msra.gmra.mrb[0].mxu1 %vm715_vm4, %v4493_v45  ;;  %3806 = vmatprep.mubr.msk.bf16.mxu0 %vm715_vm4, %v4947_v8  ;;  %v5006_v17 = vcombine.low %v4674_v1, %v4680_v38  ;;  %v5010_v22 = vcombine.low %v4702_v5, %v4722_v9  ;;  %v5014_v36 = vcombine.low %v4745_v35, %v4754_v24  ;;  %v5568_v38 = vld [vmem:[#allocation20_spill] sm:$0xff]  ;;  %v1350_v24 = vrot.slane %v4862_v25, 5 }
  0x7a   : > { %3658 = vmatprep.mubr.msk.bf16.mxu1 %vm715_vm4, %v4953_v58  ;;  %3687 = vmatpush3.bf16.msra.mxu1 %v4472_v26  ;;  %v3310_v26 = vrot.slane %v4745_v35, 9  ;;  %v5025_v1 = vcombine.low %v4787_v43, %v4794_v10  ;;  %v5029_v5 = vcombine.low %v5568_v38, %v4829_v63  ;;  %v5033_v9 = vcombine.low %v4854_v2, %v4862_v25  ;;  %v5569_v10 = vld [vmem:[#allocation5_spill] sm:$0xff] }
  0x7b   : > { %v1333_v35 = vsel %vm4709_vm8, %v1331_v6, %v1332_v31  ;;  %v1343_v43 = vrot.slane %v4829_v63, 5  ;;  %v5044_v48 = vand.u32 %v3347_v32, %v5569_v10  ;;  %v1337_v55 = vsel %vm4709_vm8, %v3311_v0, %v1336_v60 }
  0x7c   : > { %v1330_v44 = vsel %vm4709_vm8, %v3310_v26, %v1329_v30  ;;  %v1340_v27 = vsel %vm4709_vm8, %v1338_v39, %v1339_v7  ;;  %v5054_v12 = vcombine.low %v4551_v56, %v4558_v61  ;;  %v3312_v25 = vrot.slane %v5568_v38, 9  ;;  %v273_v30 = vld [vmem:[%s4435_s17 + $0xc8] sm:$0x1] }
  0x7d   : > { %3720 = vmatprep.subr.bf16.mxu1 %v5044_v48  ;;  %v5057_v63 = vcombine.low %v1330_v44, %v1333_v35  ;;  %v1346_v50 = vrot.slane %v5570_v51, 5  ;;  %v3313_v49 = vrot.slane %v4854_v2, 9  ;;  %v5062_v18 = vcombine.low %v1337_v55, %v1340_v27  ;;  %v5077_v2 = vld [vmem:[%s4435_s17 + $0xc0] sm:$0xf] }
  0x7e   : > { %v1345_v4 = vrot.slane %v1343_v43, 4  ;;  %v1352_v19 = vrot.slane %v1350_v24, 4  ;;  %v1353_v57 = vrot.slane %v4871_v3, 5  ;;  %v5070_v56 = vcombine.low %v4575_v28, %v4582_v33 }
  0x7f   : > { %v1344_v61 = vsel %vm4709_vm8, %v3312_v25, %v1343_v43  ;;  %v2086_v11 = vrot.slane %v5066_v21, 5  ;;  %v1351_v33 = vsel %vm4709_vm8, %v3313_v49, %v1350_v24  ;;  %v3383_v40 = vrot.slane %v5077_v2, 9 }
  0x80   : > { %3807 = vmatmul.mubr.msk.bf16.gmra.mrb[16].mxu0 %vm715_vm4, %v4992_v42  ;;  %v1347_v28 = vsel %vm4709_vm8, %v1345_v4, %v1346_v50  ;;  %v1354_v3 = vsel %vm4709_vm8, %v1352_v19, %v1353_v57  ;;  %v2089_v60 = vrot.slane %v273_v30, 5  ;;  %v1856_v26 = vshrl.u32 %v5077_v2, 16  ;;  %v3439_v57 = vld [vmem:[%s5502_s1 + $0x10] sm:$0x3] }
  0x81   : > { %3659 = vmatmul.mubr.msk.bf16.gmra.mrb[4].mxu1 %vm715_vm4, %v4986_v29  ;;  %3810 = vmatprep.mubr.msk.bf16.mxu0 %vm715_vm4, %v4999_v34  ;;  %v5094_v46 = vcombine.low %v1344_v61, %v1347_v28  ;;  %v5096_v37 = vcombine.low %v1351_v33, %v1354_v3  ;;  %v2088_v54 = vrot.slane %v2086_v11, 4  ;;  %v1859_v6 = vshll.u32 %v5077_v2, 16  ;;  %v4254_v28 = vld [vmem:[%s4435_s17 + $0x4] sm:$0xf]  ;;  %v4255_v3 = vld [vmem:[%s4435_s17 + $0x8] sm:$0x1] }
  0x82   : > { %3662 = vmatprep.mubr.msk.bf16.mxu1 %vm715_vm4, %v4996_v62  ;;  %v1865_v31 = vshll.u32 %v5066_v21, 16  ;;  %v1869_v0 = vshrl.u32 %v5066_v21, 16  ;;  %v1858_v7 = vrot.slane %v1856_v26, 4  ;;  %v2087_v38 = vsel %vm4709_vm8, %v3383_v40, %v2086_v11  ;;  %v5571_v11 = vld [vmem:[#allocation7_spill] sm:$0xff] }
  0x83   : > { %v1861_v39 = vrot.slane %v1859_v6, 5  ;;  %v2090_v35 = vsel %vm4709_vm8, %v2088_v54, %v2089_v60  ;;  %v1875_v55 = vshll.u32 %v273_v30, 16  ;;  %v2746_v61 = vand.u32 %v3439_v57, %v5569_v10  ;;  %v4256_v10 = vld [vmem:[%s4435_s17] sm:$0xf] }
  0x84   : > { %v1867_v32 = vrot.slane %v1865_v31, 5  ;;  %v1871_v44 = vrot.slane %v1869_v0, 4  ;;  %v5114_v50 = vcombine.low %v2087_v38, %v2090_v35  ;;  %v1245_v33 = vrot.slane %v4254_v28, 5  ;;  %v5572_v31 = vld [vmem:[#allocation16_spill] sm:$0xff]  ;;  %v5573_v0 = vld [vmem:[#allocation18_spill] sm:$0xff]  ;;  %v5578_v35 = vld [vmem:[#allocation9_spill] sm:$0xff] }
  0x85   : > { %v1862_v43 = vor.u32 %v1861_v39, %v1858_v7  ;;  %v1877_v51 = vrot.slane %v1875_v55, 5  ;;  %v1248_v30 = vrot.slane %v4255_v3, 5  ;;  %v3298_v40 = vrot.slane %v4256_v10, 9  ;;  %v5574_v7 = vld [vmem:[#allocation6_spill] sm:$0xff]  ;;  %v5581_v55 = vld [vmem:[#allocation12_spill] sm:$0xff]  ;;  %v5588_v10 = vld [vmem:[#allocation25_spill] sm:$0xff] }
  0x86   : > { %v1872_v24 = vor.u32 %v1871_v44, %v1867_v32  ;;  %v1247_v54 = vrot.slane %v1245_v33, 4  ;;  %v5575_v39 = vld [vmem:[#allocation22_spill] sm:$0xff] }
  0x87   : > { %v1863_v27 = vrot.slane %v1862_v43, 4  ;;  %v1246_v60 = vsel %vm4709_vm8, %v3298_v40, %v1245_v33  ;;  %v5202_v44 = vld [vmem:[%s4435_s17 + $0xcc] sm:$0xf]  ;;  %v5205_v38 = vld [vmem:[%s4435_s17 + $0xd0] sm:$0xf] }
  0x88   : > { %3811 = vmatmul.mubr.msk.bf16.gmra.mrb[20].mxu0 %vm715_vm4, %v5057_v63  ;;  %v1873_v25 = vrot.slane %v1872_v24, 4  ;;  %v1249_v26 = vsel %vm4709_vm8, %v1247_v54, %v1248_v30  ;;  %v5579_v43 = vld [vmem:[#allocation10_spill] sm:$0xff]  ;;  %v5580_v24 = vld [vmem:[#allocation11_spill] sm:$0xff]  ;;  %v2505_v57 = vshll.u32 %v5202_v44, 16  ;;  %v2732_v41 = vrot.slane %v5205_v38, 5 }
  0x89   : > { %3663 = vmatmul.mubr.msk.bf16.gmra.mrb[8].mxu1 %vm715_vm4, %v5054_v12  ;;  %3814 = vmatprep.mubr.msk.bf16.mxu0 %vm715_vm4, %v5062_v18  ;;  %v1868_v49 = vsel %vm4487_vm5, %v1863_v27, %v1867_v32  ;;  %v3315_v6 = vcombine.low %v1246_v60, %v1249_v26  ;;  %v5576_v32 = vld [vmem:[#allocation24_spill] sm:$0xff]  ;;  %v5582_v27 = vld [vmem:[#allocation13_spill] sm:$0xff]  ;;  %v276_v30 = vld [vmem:[%s4435_s17 + $0xd4] sm:$0x1] }
  0x8a   : > { %3666 = vmatprep.mubr.msk.bf16.mxu1 %vm715_vm4, %v5070_v56  ;;  %v1878_v4 = vsel %vm4487_vm5, %v1873_v25, %v1877_v51  ;;  %v5583_v25 = vld [vmem:[#allocation14_spill] sm:$0xff]  ;;  %v5584_v51 = vld [vmem:[#allocation15_spill] sm:$0xff]  ;;  %v2507_v28 = vrot.slane %v2505_v57, 5  ;;  %v2521_v54 = vshll.u32 %v276_v30, 16 }
  0x8b   : > { %v5120_v19 = vcombine.low %v1868_v49, %v1878_v4  ;;  %v5585_v49 = vld [vmem:[#allocation17_spill] sm:$0xff]  ;;  %v5586_v4 = vld [vmem:[#allocation19_spill] sm:$0xff] }
  0x8c   : > { %v2523_v26 = vrot.slane %v2521_v54, 5 }
  0x90   : > { %3815 = vmatmul.mubr.msk.bf16.gmra.mrb[24].mxu0 %vm715_vm4, %v5094_v46 }
  0x91   : > { %3667 = vmatmul.mubr.msk.bf16.gmra.mrb[12].mxu1 %vm715_vm4, %v4962_v14  ;;  %3818 = vmatprep.mubr.msk.bf16.mxu0 %vm715_vm4, %v5096_v37 }
  0x92   : > { %3670 = vmatprep.mubr.msk.bf16.mxu1 %vm715_vm4, %v4982_v59 }
  0x98   : > { %3819 = vmatmul.mubr.msk.bf16.gmra.mrb[28].mxu0 %vm715_vm4, %v5114_v50 }
  0x99   : > { %3671 = vmatmul.mubr.msk.bf16.gmra.mrb[16].mxu1 %vm715_vm4, %v4990_v20  ;;  %3824 = vmatprep.mubr.msk.bf16.mxu0 %vm715_vm4, %v4953_v58 }
  0x9a   : > { %3674 = vmatprep.mubr.msk.bf16.mxu1 %vm715_vm4, %v5006_v17 }
  0xa0   : > { %3825 = vmatmul.mubr.msk.bf16.vlgmr.msra.gmra.mrb[0].mxu0 %vm715_vm4, %v4986_v29 }
  0xa1   : > { %3675 = vmatmul.mubr.msk.bf16.gmra.mrb[20].mxu1 %vm715_vm4, %v5010_v22  ;;  %3857 = vmatpush3.bf16.msra.mxu0 %v5571_v11  ;;  %v2511_v11 = vshll.u32 %v5205_v38, 16 }
  0xa2   : > { %3678 = vmatprep.mubr.msk.bf16.mxu1 %vm715_vm4, %v5014_v36  ;;  %3828 = vmatprep.mubr.msk.bf16.mxu0 %vm715_vm4, %v4996_v62 }
  0xa3   : > { %3890 = vmatprep.subr.bf16.mxu0 %v2746_v61  ;;  %v2513_v33 = vrot.slane %v2511_v11, 5 }
  0xa8   : > { %3829 = vmatmul.mubr.msk.bf16.gmra.mrb[4].mxu0 %vm715_vm4, %v5054_v12 }
  0xa9   : > { %3679 = vmatmul.mubr.msk.bf16.gmra.mrb[24].mxu1 %vm715_vm4, %v5025_v1  ;;  %3832 = vmatprep.mubr.msk.bf16.mxu0 %vm715_vm4, %v5070_v56 }
  0xaa   : > { %3682 = vmatprep.mubr.msk.bf16.mxu1 %vm715_vm4, %v5029_v5 }
  0xb0   : > { %3833 = vmatmul.mubr.msk.bf16.gmra.mrb[8].mxu0 %vm715_vm4, %v4962_v14 }
  0xb1   : > { %3683 = vmatmul.mubr.msk.bf16.gmra.mrb[28].mxu1 %vm715_vm4, %v5033_v9  ;;  %3836 = vmatprep.mubr.msk.bf16.mxu0 %vm715_vm4, %v4982_v59 }
  0xb2   : > { %3688 = vmatprep.mubr.msk.bf16.mxu1 %vm715_vm4, %v3315_v6 }
  0xb8   : > { %3837 = vmatmul.mubr.msk.bf16.gmra.mrb[12].mxu0 %vm715_vm4, %v4990_v20 }
  0xb9   : > { %3689 = vmatmul.mubr.msk.bf16.vlgmr.msra.gmra.mrb[0].mxu1 %vm715_vm4, %v5572_v31  ;;  %3840 = vmatprep.mubr.msk.bf16.mxu0 %vm715_vm4, %v5006_v17 }
  0xba   : > { %3692 = vmatprep.mubr.msk.bf16.mxu1 %vm715_vm4, %v5573_v0  ;;  %3721 = vmatpush3.bf16.msra.mxu1 %v5044_v48  ;;  %v5193_v48 = vcombine.low %v5077_v2, %v5066_v21  ;;  %v3403_v21 = vcombine.low %v5202_v44, %v5205_v38  ;;  %v5577_v2 = vld [vmem:[#allocation8_spill] sm:$0xff] }
  0xbb   : > { %3934 = vmatprep.subr.bf16.mxu1 %v5574_v7 }
  0xc0   : > { %3841 = vmatmul.mubr.msk.bf16.gmra.mrb[16].mxu0 %vm715_vm4, %v5010_v22 }
  0xc1   : > { %3693 = vmatmul.mubr.msk.bf16.gmra.mrb[4].mxu1 %vm715_vm4, %v5575_v39  ;;  %3844 = vmatprep.mubr.msk.bf16.mxu0 %vm715_vm4, %v5014_v36 }
  0xc2   : > { %3696 = vmatprep.mubr.msk.bf16.mxu1 %vm715_vm4, %v5576_v32 }
  0xc8   : > { %3845 = vmatmul.mubr.msk.bf16.gmra.mrb[20].mxu0 %vm715_vm4, %v5025_v1 }
  0xc9   : > { %3697 = vmatmul.mubr.msk.bf16.gmra.mrb[8].mxu1 %vm715_vm4, %v4890_v16  ;;  %3848 = vmatprep.mubr.msk.bf16.mxu0 %vm715_vm4, %v5029_v5 }
  0xca   : > { %3700 = vmatprep.mubr.msk.bf16.mxu1 %vm715_vm4, %v4917_v15 }
  0xd0   : > { %3849 = vmatmul.mubr.msk.bf16.gmra.mrb[24].mxu0 %vm715_vm4, %v5033_v9 }
  0xd1   : > { %3701 = vmatmul.mubr.msk.bf16.gmra.mrb[12].mxu1 %vm715_vm4, %v4924_v52  ;;  %3852 = vmatprep.mubr.msk.bf16.mxu0 %vm715_vm4, %v5193_v48 }
  0xd2   : > { %3704 = vmatprep.mubr.msk.bf16.mxu1 %vm715_vm4, %v4943_v53 }
  0xd8   : > { %3853 = vmatmul.mubr.msk.bf16.gmra.mrb[28].mxu0 %vm715_vm4, %v3403_v21 }
  0xd9   : > { %3705 = vmatmul.mubr.msk.bf16.gmra.mrb[16].mxu1 %vm715_vm4, %v4947_v8  ;;  %3858 = vmatprep.mubr.msk.bf16.mxu0 %vm715_vm4, %v5577_v2  ;;  %v5375_v2 = vld [vmem:[%s5503_s2] ss:$0 sm:$0xff] }
  0xda   : > { %3708 = vmatprep.mubr.msk.bf16.mxu1 %vm715_vm4, %v4992_v42 }
  0xe0   : > { %3859 = vmatmul.mubr.msk.bf16.vlgmr.msra.gmra.mrb[0].mxu0 %vm715_vm4, %v5578_v35 }
  0xe1   : > { %3709 = vmatmul.mubr.msk.bf16.gmra.mrb[20].mxu1 %vm715_vm4, %v4999_v34  ;;  %3891 = vmatpush3.bf16.msra.mxu0 %v2746_v61  ;;  %v2515_v61 = vshrl.u32 %v5205_v38, 16 }
  0xe2   : > { %3712 = vmatprep.mubr.msk.bf16.mxu1 %vm715_vm4, %v5057_v63  ;;  %3862 = vmatprep.mubr.msk.bf16.mxu0 %vm715_vm4, %v5579_v43 }
  0xe3   : > { %v2517_v3 = vrot.slane %v2515_v61, 4 }
  0xe5   : > { %v2518_v40 = vor.u32 %v2517_v3, %v2513_v33 }
  0xe7   : > { %v2519_v60 = vrot.slane %v2518_v40, 4 }
  0xe8   : > { %3863 = vmatmul.mubr.msk.bf16.gmra.mrb[4].mxu0 %vm715_vm4, %v5580_v24 }
  0xe9   : > { %3713 = vmatmul.mubr.msk.bf16.gmra.mrb[24].mxu1 %vm715_vm4, %v5062_v18  ;;  %3866 = vmatprep.mubr.msk.bf16.mxu0 %vm715_vm4, %v5581_v55  ;;  %v2524_v6 = vsel %vm4487_vm5, %v2519_v60, %v2523_v26 }
  0xea   : > { %3716 = vmatprep.mubr.msk.bf16.mxu1 %vm715_vm4, %v5094_v46 }
  0xf0   : > { %3867 = vmatmul.mubr.msk.bf16.gmra.mrb[8].mxu0 %vm715_vm4, %v5582_v27 }
  0xf1   : > { %3717 = vmatmul.mubr.msk.bf16.gmra.mrb[28].mxu1 %vm715_vm4, %v5096_v37  ;;  %3870 = vmatprep.mubr.msk.bf16.mxu0 %vm715_vm4, %v5583_v25 }
  0xf2   : > { %3722 = vmatprep.mubr.msk.bf16.mxu1 %vm715_vm4, %v4493_v45  ;;  %v2502_v45 = vshrl.u32 %v5202_v44, 16 }
  0xf8   : > { %3871 = vmatmul.mubr.msk.bf16.gmra.mrb[12].mxu0 %vm715_vm4, %v5584_v51 }
  0xf9   : > { %3723 = vmatmul.mubr.msk.bf16.vlgmr.msra.gmra.mrb[0].mxu1 %vm715_vm4, %v4953_v58  ;;  %3874 = vmatprep.mubr.msk.bf16.mxu0 %vm715_vm4, %v5585_v49  ;;  %v5587_v58 = vld [vmem:[#allocation21_spill] sm:$0xff] }
  0xfa   : > { %3726 = vmatprep.mubr.msk.bf16.mxu1 %vm715_vm4, %v4986_v29  ;;  %3935 = vmatpush3.bf16.msra.mxu1 %v5574_v7  ;;  %v2504_v29 = vrot.slane %v2502_v45, 4 }
 0x100   : > { %3875 = vmatmul.mubr.msk.bf16.gmra.mrb[16].mxu0 %vm715_vm4, %v5586_v4 }
 0x101   : > { %3727 = vmatmul.mubr.msk.bf16.gmra.mrb[4].mxu1 %vm715_vm4, %v4996_v62  ;;  %3878 = vmatprep.mubr.msk.bf16.mxu0 %vm715_vm4, %v5587_v58  ;;  %v2508_v62 = vor.u32 %v2507_v28, %v2504_v29 }
 0x102   : > { %3730 = vmatprep.mubr.msk.bf16.mxu1 %vm715_vm4, %v5054_v12 }
 0x103   : > { %v2509_v12 = vrot.slane %v2508_v62, 4 }
 0x108   : > { %3879 = vmatmul.mubr.msk.bf16.gmra.mrb[20].mxu0 %vm715_vm4, %v5588_v10 }
 0x109   : > { %3731 = vmatmul.mubr.msk.bf16.gmra.mrb[8].mxu1 %vm715_vm4, %v5070_v56  ;;  %3882 = vmatprep.mubr.msk.bf16.mxu0 %vm715_vm4, %v4888_v13  ;;  %v2514_v56 = vsel %vm4487_vm5, %v2509_v12, %v2513_v33 }
 0x10a   : > { %3734 = vmatprep.mubr.msk.bf16.mxu1 %vm715_vm4, %v4962_v14  ;;  %v3421_v14 = vcombine.low %v2514_v56, %v2524_v6 }
 0x110   : > { %3883 = vmatmul.mubr.msk.bf16.gmra.mrb[24].mxu0 %vm715_vm4, %v4922_v23 }
 0x111   : > { %3735 = vmatmul.mubr.msk.bf16.gmra.mrb[12].mxu1 %vm715_vm4, %v4982_v59  ;;  %3886 = vmatprep.mubr.msk.bf16.mxu0 %vm715_vm4, %v5120_v19  ;;  %v3084_v59 = vld [vmem:[%s5504_s3 + $0x8] sm:$0xff] }
 0x112   : > { %3738 = vmatprep.mubr.msk.bf16.mxu1 %vm715_vm4, %v4990_v20 }
 0x118   : > { %3887 = vmatmul.mubr.msk.bf16.gmra.mrb[28].mxu0 %vm715_vm4, %v3421_v14 }
 0x119   : > { %3739 = vmatmul.mubr.msk.bf16.gmra.mrb[16].mxu1 %vm715_vm4, %v5006_v17  ;;  %3892 = vmatprep.mubr.msk.bf16.mxu0 %vm715_vm4, %v5573_v0 }
 0x11a   : > { %3742 = vmatprep.mubr.msk.bf16.mxu1 %vm715_vm4, %v5010_v22 }
 0x120   : > { %3893 = vmatmul.mubr.msk.bf16.vlgmr.msra.gmra.mrb[0].mxu0 %vm715_vm4, %v5575_v39 }
 0x121   : > { %3743 = vmatmul.mubr.msk.bf16.gmra.mrb[20].mxu1 %vm715_vm4, %v5014_v36  ;;  %3896 = vmatprep.mubr.msk.bf16.mxu0 %vm715_vm4, %v5576_v32 }
 0x122   : > { %3746 = vmatprep.mubr.msk.bf16.mxu1 %vm715_vm4, %v5025_v1 }
 0x128   : > { %3897 = vmatmul.mubr.msk.bf16.gmra.mrb[4].mxu0 %vm715_vm4, %v4890_v16  ;;  %v3438_v16 = vrot.slane %v5202_v44, 9 }
 0x129   : > { %3747 = vmatmul.mubr.msk.bf16.gmra.mrb[24].mxu1 %vm715_vm4, %v5029_v5  ;;  %3900 = vmatprep.mubr.msk.bf16.mxu0 %vm715_vm4, %v4917_v15  ;;  %v2735_v15 = vrot.slane %v276_v30, 5 }
 0x12a   : > { %3750 = vmatprep.mubr.msk.bf16.mxu1 %vm715_vm4, %v5033_v9 }
 0x130   : > { %3901 = vmatmul.mubr.msk.bf16.gmra.mrb[8].mxu0 %vm715_vm4, %v4924_v52 }
 0x131   : > { %3751 = vmatmul.mubr.msk.bf16.gmra.mrb[28].mxu1 %vm715_vm4, %v5193_v48  ;;  %3904 = vmatprep.mubr.msk.bf16.mxu0 %vm715_vm4, %v4943_v53 }
 0x132   : > { %3776 = vmatprep.mubr.msk.bf16.mxu1 %vm715_vm4, %v5586_v4 }
 0x138   : > { %3905 = vmatmul.mubr.msk.bf16.gmra.mrb[12].mxu0 %vm715_vm4, %v4947_v8  ;;  %v3083_v8 = vld [vmem:[%s5504_s3] sm:$0xff] }
 0x139   : > { %3777 = vmatmul.mubr.msk.bf16.vlgmr.msra.gmra.mrb[20].mxu1 %vm715_vm4, %v5587_v58  ;;  %3908 = vmatprep.mubr.msk.bf16.mxu0 %vm715_vm4, %v4992_v42  ;;  %v3932_v20 = vpack.c.bf16 %v3084_v59, %v3083_v8  ;;  %v4322_v42 = vmov 0.0|0.0  }
 0x13a   : > { %3780 = vmatprep.mubr.msk.bf16.mxu1 %vm715_vm4, %v5588_v10  ;;  %3931 = vmatprep.subr.bf16.mxu1 %v4322_v42 }
 0x13b   : > { %3933 = vmatpush3.bf16.msra.mxu1 %v3932_v20 }
 0x140   : > { %3909 = vmatmul.mubr.msk.bf16.gmra.mrb[16].mxu0 %vm715_vm4, %v4999_v34  ;;  %v4324_v34 = vmov 0.0  }
 0x141   : > { %3781 = vmatmul.mubr.msk.bf16.gmra.mrb[24].mxu1 %vm715_vm4, %v4888_v13  ;;  %3912 = vmatprep.mubr.msk.bf16.mxu0 %vm715_vm4, %v5057_v63  ;;  %v2734_v13 = vrot.slane %v2732_v41, 4 }
 0x142   : > { %3784 = vmatprep.mubr.msk.bf16.mxu1 %vm715_vm4, %v4922_v23  ;;  %v2733_v23 = vsel %vm4709_vm8, %v3438_v16, %v2732_v41 }
 0x143   : > { %v2736_v52 = vsel %vm4709_vm8, %v2734_v13, %v2735_v15 }
 0x144   : > { %v3440_v53 = vcombine.low %v2733_v23, %v2736_v52 }
 0x148   : > { %3913 = vmatmul.mubr.msk.bf16.gmra.mrb[20].mxu0 %vm715_vm4, %v5062_v18 }
 0x149   : > { %3785 = vmatmul.mubr.msk.bf16.gmra.mrb[28].mxu1 %vm715_vm4, %v5120_v19  ;;  %3916 = vmatprep.mubr.msk.bf16.mxu0 %vm715_vm4, %v5094_v46 }
 0x14a   : > { %3928 = vmatprep.mubr.msk.f32.mxu1 %vm4323_vm9, %v4324_v34 }
 0x150   : > { %3917 = vmatmul.mubr.msk.bf16.gmra.mrb[24].mxu0 %vm715_vm4, %v5096_v37 }
 0x151   : > { %3920 = vmatprep.mubr.msk.bf16.mxu0 %vm715_vm4, %v5114_v50 }
 0x158   : > { %3921 = vmatmul.mubr.msk.bf16.gmra.mrb[28].mxu0 %vm715_vm4, %v3440_v53 }
 0x1cc   : > { %v3724_v47 = vpop.f32.mrb[0].mxu1 }
 0x1cd   : > { %v1696_v17 = vpop.f32.mrb[1].mxu1 }
 0x1ce   : > { %v3725_v22 = vpop.f32.mrb[2].mxu1 }
 0x1cf   : > { %v1699_v36 = vpop.f32.mrb[3].mxu1 }
 0x1d4   : > { %v3728_v1 = vpop.f32.mrb[4].mxu1 }
 0x1d5   : > { %v1712_v5 = vpop.f32.mrb[5].mxu1 }
 0x1d6   : > { %v3729_v9 = vpop.f32.mrb[6].mxu1 }
 0x1d7   : > { %v1715_v63 = vpop.f32.mrb[7].mxu1 }
 0x1dc   : > { %v3732_v18 = vpop.f32.mrb[8].mxu1 }
 0x1dd   : > { %v1728_v46 = vpop.f32.mrb[9].mxu1 }
 0x1de   : > { %v3733_v37 = vpop.f32.mrb[10].mxu1 }
 0x1df   : > { %v5354_v50 = vpop.f32.mrb[11].mxu1 }
 0x1e4   : > { %v5356_v19 = vpop.f32.mrb[12].mxu1 }
 0x1e5   : > { %v5358_v31 = vpop.f32.mrb[13].mxu1 }
 0x1e6   : > { %v5360_v0 = vpop.f32.mrb[14].mxu1 }
 0x1e7   : > { %v5362_v7 = vpop.f32.mrb[15].mxu1 }
 0x1ec   : > { %v5364_v39 = vpop.f32.mrb[16].mxu1 }
 0x1ed   : > { %v5366_v32 = vpop.f32.mrb[17].mxu1 }
 0x1ee   : > { %v5368_v48 = vpop.f32.mrb[18].mxu1 }
 0x1ef   : > { %v5370_v44 = vpop.f32.mrb[19].mxu1 }
 0x1f3   : > { %v3894_v38 = vpop.f32.mrb[0].mxu0 }
 0x1f4   : > { %v3936_v21 = vadd.f32 %v3894_v38, %v3724_v47  ;;  %v2782_v35 = vpop.f32.mrb[1].mxu0 }
 0x1f5   : > { %v3937_v43 = vadd.f32 %v2782_v35, %v1696_v17  ;;  %v3895_v24 = vpop.f32.mrb[2].mxu0 }
 0x1f6   : > { %v3938_v55 = vadd.f32 %v3895_v24, %v3725_v22  ;;  %v2785_v27 = vpop.f32.mrb[3].mxu0  ;;  %v2950_v25 = vadd.f32 %v3936_v21, %v5375_v2 }
 0x1f7   : > { %v2948_v51 = vadd.f32 %v3937_v43, %v5375_v2  ;;  %v3939_v49 = vadd.f32 %v2785_v27, %v1699_v36 }
 0x1f8   : > { %v2951_v45 = vadd.f32 %v3938_v55, %v5375_v2  ;;  %v2982_v61 = vmax.f32 %v2950_v25, 0.0 }
 0x1f9   : > { %v2980_v4 = vmax.f32 %v2948_v51, 0.0  ;;  %v2949_v57 = vadd.f32 %v3939_v49, %v5375_v2 }
 0x1fa   : > { %v2983_v3 = vmax.f32 %v2951_v45, 0.0  ;;  %v3016_v60 = vsel %vm3012_vm10, %v2982_v61, 0.0 }
 0x1fb   : > { %v2981_v58 = vmax.f32 %v2949_v57, 0.0  ;;  %v3898_v11 = vpop.f32.mrb[4].mxu0  ;;  %v3013_v33 = vsel %vm3012_vm10, %v2980_v4, 0.0 }
 0x1fc   : > { %v3940_v29 = vadd.f32 %v3898_v11, %v3728_v1  ;;  %v2798_v28 = vpop.f32.mrb[5].mxu0  ;;  %v3018_v41 = vsel %vm3012_vm10, %v2983_v3, 0.0 }
 0x1fd   : > { %v3014_v30 = vsel %vm3012_vm10, %v2981_v58, 0.0  ;;  %v3941_v10 = vadd.f32 %v2798_v28, %v1712_v5  ;;  %v3899_v62 = vpop.f32.mrb[6].mxu0 }
 0x1fe   : > { %v3015_v40 = vadd.f32 %v3014_v30, %v3013_v33  ;;  %v3942_v54 = vadd.f32 %v3899_v62, %v3729_v9  ;;  %v2801_v12 = vpop.f32.mrb[7].mxu0  ;;  %v2954_v26 = vadd.f32 %v3940_v29, %v5375_v2 }
 0x1ff   : > { %v2952_v56 = vadd.f32 %v3941_v10, %v5375_v2  ;;  %v3943_v6 = vadd.f32 %v2801_v12, %v1715_v63 }
 0x200   : > { %v3017_v14 = vadd.f32 %v3016_v60, %v3015_v40  ;;  %v2955_v13 = vadd.f32 %v3942_v54, %v5375_v2  ;;  %v2986_v52 = vmax.f32 %v2954_v26, 0.0 }
 0x201   : > { %v2984_v16 = vmax.f32 %v2952_v56, 0.0  ;;  %v2953_v15 = vadd.f32 %v3943_v6, %v5375_v2 }
 0x202   : > { %v3019_v23 = vadd.f32 %v3018_v41, %v3017_v14  ;;  %v2987_v47 = vmax.f32 %v2955_v13, 0.0  ;;  %v3024_v63 = vsel %vm3012_vm10, %v2986_v52, 0.0 }
 0x203   : > { %v3020_v53 = vsel %vm3012_vm10, %v2984_v16, 0.0  ;;  %v2985_v8 = vmax.f32 %v2953_v15, 0.0  ;;  %v3902_v59 = vpop.f32.mrb[8].mxu0 }
 0x204   : > { %v3021_v20 = vadd.f32 %v3020_v53, %v3019_v23  ;;  %v3944_v42 = vadd.f32 %v3902_v59, %v3732_v18  ;;  %v2814_v34 = vpop.f32.mrb[9].mxu0  ;;  %v3026_v18 = vsel %vm3012_vm10, %v2987_v47, 0.0 }
 0x205   : > { %v3022_v17 = vsel %vm3012_vm10, %v2985_v8, 0.0  ;;  %v3945_v22 = vadd.f32 %v2814_v34, %v1728_v46  ;;  %v3903_v36 = vpop.f32.mrb[10].mxu0 }
 0x206   : > { %v3023_v1 = vadd.f32 %v3022_v17, %v3021_v20  ;;  %v3946_v5 = vadd.f32 %v3903_v36, %v3733_v37  ;;  %v2817_v9 = vpop.f32.mrb[11].mxu0  ;;  %v2958_v38 = vadd.f32 %v3944_v42, %v5375_v2 }
 0x207   : > { %v2956_v21 = vadd.f32 %v3945_v22, %v5375_v2  ;;  %v3947_v35 = vadd.f32 %v2817_v9, %v5354_v50 }
 0x208   : > { %v3025_v43 = vadd.f32 %v3024_v63, %v3023_v1  ;;  %v2959_v55 = vadd.f32 %v3946_v5, %v5375_v2  ;;  %v2990_v25 = vmax.f32 %v2958_v38, 0.0 }
 0x209   : > { %v2988_v24 = vmax.f32 %v2956_v21, 0.0  ;;  %v2957_v46 = vadd.f32 %v3947_v35, %v5375_v2 }
 0x20a   : > { %v3027_v27 = vadd.f32 %v3026_v18, %v3025_v43  ;;  %v2991_v50 = vmax.f32 %v2959_v55, 0.0  ;;  %v3032_v62 = vsel %vm3012_vm10, %v2990_v25, 0.0 }
 0x20b   : > { %v3028_v37 = vsel %vm3012_vm10, %v2988_v24, 0.0  ;;  %v2989_v51 = vmax.f32 %v2957_v46, 0.0  ;;  %v3906_v49 = vpop.f32.mrb[12].mxu0 }
 0x20c   : > { %v3029_v4 = vadd.f32 %v3028_v37, %v3027_v27  ;;  %v3778_v45 = vpop.f32.mrb[20].mxu1  ;;  %v3948_v57 = vadd.f32 %v3906_v49, %v5356_v19  ;;  %v2830_v61 = vpop.f32.mrb[13].mxu0  ;;  %v3034_v26 = vsel %vm3012_vm10, %v2991_v50, 0.0 }
 0x20d   : > { %v3030_v58 = vsel %vm3012_vm10, %v2989_v51, 0.0  ;;  %v2004_v11 = vpop.f32.mrb[21].mxu1  ;;  %v3949_v29 = vadd.f32 %v2830_v61, %v5358_v31  ;;  %v3907_v28 = vpop.f32.mrb[14].mxu0 }
 0x20e   : > { %v3031_v33 = vadd.f32 %v3030_v58, %v3029_v4  ;;  %v3779_v3 = vpop.f32.mrb[22].mxu1  ;;  %v3950_v30 = vadd.f32 %v3907_v28, %v5360_v0  ;;  %v2833_v10 = vpop.f32.mrb[15].mxu0  ;;  %v2962_v40 = vadd.f32 %v3948_v57, %v5375_v2 }
 0x20f   : > { %v2960_v54 = vadd.f32 %v3949_v29, %v5375_v2  ;;  %v2007_v19 = vpop.f32.mrb[23].mxu1  ;;  %v3951_v12 = vadd.f32 %v2833_v10, %v5362_v7 }
 0x210   : > { %v3033_v60 = vadd.f32 %v3032_v62, %v3031_v33  ;;  %v2963_v31 = vadd.f32 %v3950_v30, %v5375_v2  ;;  %v2994_v0 = vmax.f32 %v2962_v40, 0.0 }
 0x211   : > { %v2992_v56 = vmax.f32 %v2960_v54, 0.0  ;;  %v2961_v6 = vadd.f32 %v3951_v12, %v5375_v2 }
 0x212   : > { %v3035_v14 = vadd.f32 %v3034_v26, %v3033_v60  ;;  %v2995_v7 = vmax.f32 %v2963_v31, 0.0  ;;  %v3040_v36 = vsel %vm3012_vm10, %v2994_v0, 0.0 }
 0x213   : > { %v3036_v41 = vsel %vm3012_vm10, %v2992_v56, 0.0  ;;  %v2993_v16 = vmax.f32 %v2961_v6, 0.0  ;;  %v3910_v13 = vpop.f32.mrb[16].mxu0 }
 0x214   : > { %v3037_v15 = vadd.f32 %v3036_v41, %v3035_v14  ;;  %v3782_v23 = vpop.f32.mrb[24].mxu1  ;;  %v3952_v52 = vadd.f32 %v3910_v13, %v5364_v39  ;;  %v2846_v53 = vpop.f32.mrb[17].mxu0  ;;  %v3042_v38 = vsel %vm3012_vm10, %v2995_v7, 0.0 }
 0x215   : > { %v3038_v8 = vsel %vm3012_vm10, %v2993_v16, 0.0  ;;  %v2020_v59 = vpop.f32.mrb[25].mxu1  ;;  %v3953_v20 = vadd.f32 %v2846_v53, %v5366_v32  ;;  %v3911_v42 = vpop.f32.mrb[18].mxu0 }
 0x216   : > { %v3039_v34 = vadd.f32 %v3038_v8, %v3037_v15  ;;  %v3783_v47 = vpop.f32.mrb[26].mxu1  ;;  %v3954_v17 = vadd.f32 %v3911_v42, %v5368_v48  ;;  %v2849_v22 = vpop.f32.mrb[19].mxu0  ;;  %v2966_v1 = vadd.f32 %v3952_v52, %v5375_v2 }
 0x217   : > { %v2964_v5 = vadd.f32 %v3953_v20, %v5375_v2  ;;  %v2023_v39 = vpop.f32.mrb[27].mxu1  ;;  %v3955_v9 = vadd.f32 %v2849_v22, %v5370_v44 }
 0x218   : > { %v3041_v63 = vadd.f32 %v3040_v36, %v3039_v34  ;;  %v2967_v32 = vadd.f32 %v3954_v17, %v5375_v2  ;;  %v2998_v48 = vmax.f32 %v2966_v1, 0.0 }
 0x219   : > { %v2996_v21 = vmax.f32 %v2964_v5, 0.0  ;;  %v2965_v35 = vadd.f32 %v3955_v9, %v5375_v2 }
 0x21a   : > { %v3043_v43 = vadd.f32 %v3042_v38, %v3041_v63  ;;  %v2999_v51 = vmax.f32 %v2967_v32, 0.0  ;;  %v3048_v28 = vsel %vm3012_vm10, %v2998_v48, 0.0 }
 0x21b   : > { %v3044_v18 = vsel %vm3012_vm10, %v2996_v21, 0.0  ;;  %v2997_v24 = vmax.f32 %v2965_v35, 0.0  ;;  %v3914_v55 = vpop.f32.mrb[20].mxu0 }
 0x21c   : > { %v3045_v46 = vadd.f32 %v3044_v18, %v3043_v43  ;;  %v3786_v27 = vpop.f32.mrb[28].mxu1  ;;  %v3956_v25 = vadd.f32 %v3914_v55, %v3778_v45  ;;  %v2862_v37 = vpop.f32.mrb[21].mxu0  ;;  %v3050_v40 = vsel %vm3012_vm10, %v2999_v51, 0.0 }
 0x21d   : > { %v3046_v44 = vsel %vm3012_vm10, %v2997_v24, 0.0  ;;  %v2036_v49 = vpop.f32.mrb[29].mxu1  ;;  %v3957_v4 = vadd.f32 %v2862_v37, %v2004_v11  ;;  %v3915_v57 = vpop.f32.mrb[22].mxu0 }
 0x21e   : > { %v3047_v61 = vadd.f32 %v3046_v44, %v3045_v46  ;;  %v3787_v50 = vpop.f32.mrb[30].mxu1  ;;  %v3958_v58 = vadd.f32 %v3915_v57, %v3779_v3  ;;  %v2865_v29 = vpop.f32.mrb[23].mxu0  ;;  %v2970_v33 = vadd.f32 %v3956_v25, %v5375_v2 }
 0x21f   : > { %v2968_v30 = vadd.f32 %v3957_v4, %v5375_v2  ;;  %v2039_v10 = vpop.f32.mrb[31].mxu1  ;;  %v3959_v62 = vadd.f32 %v2865_v29, %v2007_v19 }
 0x220   : > { %v3049_v45 = vadd.f32 %v3048_v28, %v3047_v61  ;;  %v2971_v12 = vadd.f32 %v3958_v58, %v5375_v2  ;;  %v3002_v26 = vmax.f32 %v2970_v33, 0.0 }
 0x221   : > { %v3000_v54 = vmax.f32 %v2968_v30, 0.0  ;;  %v2969_v11 = vadd.f32 %v3959_v62, %v5375_v2 }
 0x222   : > { %v3051_v60 = vadd.f32 %v3050_v40, %v3049_v45  ;;  %v3003_v41 = vmax.f32 %v2971_v12, 0.0  ;;  %v3056_v7 = vsel %vm3012_vm10, %v3002_v26, 0.0 }
 0x223   : > { %v3052_v3 = vsel %vm3012_vm10, %v3000_v54, 0.0  ;;  %v3001_v56 = vmax.f32 %v2969_v11, 0.0  ;;  %v3918_v31 = vpop.f32.mrb[24].mxu0 }
 0x224   : > { %v3053_v6 = vadd.f32 %v3052_v3, %v3051_v60  ;;  %v3960_v14 = vadd.f32 %v3918_v31, %v3782_v23  ;;  %v2878_v0 = vpop.f32.mrb[25].mxu0  ;;  %v3058_v17 = vsel %vm3012_vm10, %v3003_v41, 0.0 }
 0x225   : > { %v3054_v19 = vsel %vm3012_vm10, %v3001_v56, 0.0  ;;  %v3961_v16 = vadd.f32 %v2878_v0, %v2020_v59  ;;  %v3919_v13 = vpop.f32.mrb[26].mxu0  ;;  %v3085_v56 = vld [vmem:[%s5505_s4] sm:$0x1] }
 0x226   : > { %v3055_v15 = vadd.f32 %v3054_v19, %v3053_v6  ;;  %v3962_v52 = vadd.f32 %v3919_v13, %v3783_v47  ;;  %v2881_v53 = vpop.f32.mrb[27].mxu0  ;;  %v2974_v8 = vadd.f32 %v3960_v14, %v5375_v2 }
 0x227   : > { %v2972_v20 = vadd.f32 %v3961_v16, %v5375_v2  ;;  %v3963_v42 = vadd.f32 %v2881_v53, %v2023_v39 }
 0x228   : > { %v3057_v34 = vadd.f32 %v3056_v7, %v3055_v15  ;;  %v2975_v22 = vadd.f32 %v3962_v52, %v5375_v2  ;;  %v3006_v1 = vmax.f32 %v2974_v8, 0.0 }
 0x229   : > { %v3004_v23 = vmax.f32 %v2972_v20, 0.0  ;;  %v2973_v36 = vadd.f32 %v3963_v42, %v5375_v2 }
 0x22a   : > { %v3059_v59 = vadd.f32 %v3058_v17, %v3057_v34  ;;  %v3007_v32 = vmax.f32 %v2975_v22, 0.0  ;;  %v3064_v55 = vsel %vm3012_vm10, %v3006_v1, 0.0 }
 0x22b   : > { %v3060_v47 = vsel %vm3012_vm10, %v3004_v23, 0.0  ;;  %v3005_v5 = vmax.f32 %v2973_v36, 0.0  ;;  %v3922_v9 = vpop.f32.mrb[28].mxu0 }
 0x22c   : > { %v3061_v63 = vadd.f32 %v3060_v47, %v3059_v59  ;;  %v3964_v38 = vadd.f32 %v3922_v9, %v3786_v27  ;;  %v2894_v21 = vpop.f32.mrb[29].mxu0  ;;  %v3066_v44 = vsel %vm3012_vm10, %v3007_v32, 0.0 }
 0x22d   : > { %v3062_v39 = vsel %vm3012_vm10, %v3005_v5, 0.0  ;;  %v3965_v35 = vadd.f32 %v2894_v21, %v2036_v49  ;;  %v3923_v43 = vpop.f32.mrb[30].mxu0 }
 0x22e   : > { %v3063_v48 = vadd.f32 %v3062_v39, %v3061_v63  ;;  %v3966_v18 = vadd.f32 %v3923_v43, %v3787_v50  ;;  %v2897_v24 = vpop.f32.mrb[31].mxu0  ;;  %v2978_v46 = vadd.f32 %v3964_v38, %v5375_v2 }
 0x22f   : > { %v2976_v25 = vadd.f32 %v3965_v35, %v5375_v2  ;;  %v3967_v37 = vadd.f32 %v2897_v24, %v2039_v10 }
 0x230   : > { %v3065_v51 = vadd.f32 %v3064_v55, %v3063_v48  ;;  %v2979_v4 = vadd.f32 %v3966_v18, %v5375_v2  ;;  %v3010_v61 = vmax.f32 %v2978_v46, 0.0 }
 0x231   : > { %v3008_v27 = vmax.f32 %v2976_v25, 0.0  ;;  %v2977_v57 = vadd.f32 %v3967_v37, %v5375_v2 }
 0x232   : > { %v3067_v49 = vadd.f32 %v3066_v44, %v3065_v51  ;;  %v3011_v28 = vmax.f32 %v2979_v4, 0.0  ;;  %v3072_v10 = vsel %vm3012_vm10, %v3010_v61, 0.0 }
 0x233   : > { %v3068_v50 = vsel %vm3012_vm10, %v3008_v27, 0.0  ;;  %v3009_v58 = vmax.f32 %v2977_v57, 0.0 }
 0x234   : > { %v3069_v29 = vadd.f32 %v3068_v50, %v3067_v49  ;;  %v3074_v45 = vsel %vm3012_vm10, %v3011_v28, 0.0 }
 0x235   : > { %v3070_v33 = vsel %vm3012_vm10, %v3009_v58, 0.0 }
 0x236   : > { %v3071_v30 = vadd.f32 %v3070_v33, %v3069_v29 }
 0x238   : > { %v3073_v62 = vadd.f32 %v3072_v10, %v3071_v30 }
 0x23a   : > { %v3075_v40 = vadd.f32 %v3074_v45, %v3073_v62 }
 0x23c   : > { %v3076_v54 = vrot.slane %v3075_v40, 4 }
 0x23e   : > { %v3077_v2 = vadd.f32 %v3076_v54, %v3075_v40 }
 0x240   : > { %v3078_v12 = vrot.slane %v3077_v2, 2 }
 0x242   : > { %v3079_v11 = vadd.f32 %v3078_v12, %v3077_v2 }
 0x244   : > { %v3080_v60 = vrot.slane %v3079_v11, 1 }
 0x246   : > { %v3081_v26 = vadd.f32 %v3080_v60, %v3079_v11 }
 0x248   : > { %v3082_v3 = vmul.f32 0.00390625, %v3081_v26 }
 0x24a   : > { %3929 = vmatmul.mubr.msk.f32.vlgmr.msra.gmra.mrb[32].mxu1 %vm3012_vm10, %v3082_v3 }
 0x31d   : > { %v3155_v31 = vpop.f32.mrb[32].mxu1 }
 0x31e   : > { %v3156_v6 = vadd.f32 %v3155_v31, %v3085_v56  ;;  %v3930_v14 = vpop.f32.mrb[33].mxu1 }
 0x320   : > { %3159 = vst [vmem:[%s216_s6] sm:$0x1] %v3156_v6 }
 0x321   : > { %4270 = shalt.err (!%p4267_p3)
}
 0x322   : > { %s4271_s15 = scalar_lea.hbm %s5459_s10, 16  ;;  %s4275_s23 = scalar_lea.hbm %s5506_s5, 32 }
 0x323   : > { %p4272_p4 = scmp.ne.s32.totalorder %s5459_s10, %s4271_s15  ;;  %p4276_p9 = scmp.lt.u32.totalorder %s5459_s10, %s5506_s5 }
 0x324   : > { %p4277_p10 = scmp.lt.u32.totalorder %s4275_s23, %s4271_s15  ;;  %p4279_p12 = scmp.lt.u32.totalorder %s4271_s15, %s5459_s10 }
 0x325   : > { %p4273_p7 = pnand %p4272_p4, %p4394_p5 }
 0x326   : > { %p4278_p11 = por %p4277_p10, %p4276_p9 }
 0x327   : > { %p4274_p8 = pneg %p4273_p7 }
 0x328   : > { %p4280_p13 = por %p4279_p12, %p4278_p11 }
 0x32a   : > { %p4281_p0 = pnand %p4280_p13, %p4274_p8 }
 0x32c   : > { %4284 = shalt.err (!%p4281_p0)
}
 0x32d   : > { %4193 = dma.vmem_to_hbm [thread:$0]  (%p4394_p5), %s5461_s7, 16, %s5459_s10, %s3161_s11  }
 0x32e PF: > { %p4199_p1 = scmp.ge.s32.totalorder %s4319_s21, 2  ;;  %s3185_s30 = sand.u32 1, %s4307_s18  }
 0x32f   : > { %s3186_s6 = scalar_lea.sflag [#allocation3], %s3185_s30 }
 0x330   : > { %p4196_p2 = pnand %p4199_p1, %p4398_p6 }
 0x332   : > { %4302 = dma.done.wait (!%p4196_p2), %s3186_s6, 16  }
 0x333   : > { %4304 = vsyncadd (!%p4196_p2), %s3186_s6, 4294967280  ;;  %p15_p3 = scmp.ge.s32.totalorder %s4381_s24, 4   ;;  %s5589_s18 = smov %s4311_s19 }
 0x334   : > { %s5590_s19 = smov %s4315_s20  ;;  %s5591_s20 = smov %s4392_s27 }
 0x335   : > { %s5592_s21 = smov %s4381_s24  ;;  %17 = sbr.rel (!%p15_p3) target bundleno = 3 (0x3), region = 83 }
 0x33c   :  { %3190 = vsyncpa [#allocation3], 1 }
 0x33d   :  { %3192 = vsyncpa [#allocation3 + $0x1], 1 }

</bundles_post_ra>
